<compile_context>
chip_gen: v7x
topology: tpu7x:2x2x1
jax: 0.10.0
libtpu: 0.0.40
codegen_flags: <defaults>
</compile_context>

<pallas_src>
import functools
import math

import jax
import jax.numpy as jnp
from jax.experimental import pallas as pl
from jax.experimental.pallas import tpu as pltpu


# ----------------------------------------------------------------------------
# Fused linear kernels (matmul + epilogue), bf16 in / f32 accumulate
# ----------------------------------------------------------------------------
def _gelu_tanh(x):
    # Tanh-approximate GELU ("gelu_new"); tanh is EUP-native inside Mosaic.
    c = 0.7978845608028654  # sqrt(2/pi)
    return 0.5 * x * (1.0 + jnp.tanh(c * (x + 0.044715 * x * x * x)))


def _linear_kernel(x_ref, w_ref, b_ref, o_ref):
    acc = jnp.dot(x_ref[...], w_ref[...], preferred_element_type=jnp.float32)
    o_ref[...] = (acc + b_ref[...]).astype(o_ref.dtype)


def _linear_gelu_kernel(x_ref, w_ref, b_ref, o_ref):
    acc = jnp.dot(x_ref[...], w_ref[...], preferred_element_type=jnp.float32)
    o_ref[...] = _gelu_tanh(acc + b_ref[...]).astype(o_ref.dtype)


def _linear_tanh_kernel(x_ref, w_ref, b_ref, o_ref):
    acc = jnp.dot(x_ref[...], w_ref[...], preferred_element_type=jnp.float32)
    o_ref[...] = jnp.tanh(acc + b_ref[...]).astype(o_ref.dtype)


def _linear_res_ln_kernel(x_ref, w_ref, b_ref, res_ref, g_ref, beta_ref, o_ref):
    # y = x @ w + b + residual ; out = LayerNorm(y) * gamma + beta   (stats in f32)
    y = jnp.dot(x_ref[...], w_ref[...], preferred_element_type=jnp.float32)
    y = y + b_ref[...] + res_ref[...].astype(jnp.float32)
    mu = jnp.mean(y, axis=-1, keepdims=True)
    var = jnp.mean(jnp.square(y - mu), axis=-1, keepdims=True)
    out = (y - mu) * jax.lax.rsqrt(var + 1e-12) * g_ref[...] + beta_ref[...]
    o_ref[...] = out.astype(o_ref.dtype)


def _row_tile(m, cap=512):
    """Largest row tile <= cap that divides m (full-block fallback)."""
    if m <= cap:
        return m
    for t in (512, 256, 128, 64, 32, 16, 8):
        if m % t == 0:
            return t
    return m


def pallas_linear(x, w, b, *, activation=None, residual=None,
                  ln_gamma=None, ln_beta=None, out_dtype=jnp.bfloat16):
    """x: [M, K] bf16, w: [K, N] bf16, b: [N] f32 -> [M, N] out_dtype.

    Gridded over M (parallel axis), f32 MXU accumulation, fused epilogue.
    # TODO(synk): K-tiling with a VMEM f32 accumulator (bias applied under
    # pl.when(k == last)) for very large K; not needed at BERT-base K/N sizes.
    """
    M, K = x.shape
    K2, N = w.shape
    assert K == K2
    tm = _row_tile(M)
    grid = (M // tm,)

    b2 = b.reshape(1, N).astype(jnp.float32)
    args = [x, w, b2]
    in_specs = [
        pl.BlockSpec((tm, K), lambda i: (i, 0)),
        pl.BlockSpec((K, N), lambda i: (0, 0)),
        pl.BlockSpec((1, N), lambda i: (0, 0)),
    ]

    if residual is not None:
        kernel = _linear_res_ln_kernel
        in_specs += [
            pl.BlockSpec((tm, N), lambda i: (i, 0)),
            pl.BlockSpec((1, N), lambda i: (0, 0)),
            pl.BlockSpec((1, N), lambda i: (0, 0)),
        ]
        args += [
            residual,
            ln_gamma.reshape(1, N).astype(jnp.float32),
            ln_beta.reshape(1, N).astype(jnp.float32),
        ]
    elif activation == "gelu":
        kernel = _linear_gelu_kernel
    elif activation == "tanh":
        kernel = _linear_tanh_kernel
    else:
        kernel = _linear_kernel

    bytes_accessed = 2 * (M * K + K * N + M * N) + 4 * N
    if residual is not None:
        bytes_accessed += 2 * M * N + 8 * N
    cost = pl.CostEstimate(flops=2 * M * N * K,
                           transcendentals=M * N if activation else 0,
                           bytes_accessed=bytes_accessed)

    return pl.pallas_call(
        kernel,
        out_shape=jax.ShapeDtypeStruct((M, N), out_dtype),
        grid=grid,
        in_specs=in_specs,
        out_specs=pl.BlockSpec((tm, N), lambda i: (i, 0)),
        compiler_params=pltpu.CompilerParams(dimension_semantics=("parallel",)),
        cost_estimate=cost,
    )(*args)


# ----------------------------------------------------------------------------
# Fused self-attention kernel: scores -> softmax -> @V, per (batch, head)
# ----------------------------------------------------------------------------
def _attn_kernel(q_ref, k_ref, v_ref, o_ref, *, scale):
    q = q_ref[0, 0]                                   # [S, dh] bf16
    k = k_ref[0, 0]
    v = v_ref[0, 0]
    # q @ k^T without materializing a transpose (contract last dims of both).
    s = jax.lax.dot_general(q, k, (((1,), (1,)), ((), ())),
                            preferred_element_type=jnp.float32) * scale
    m = jnp.max(s, axis=-1, keepdims=True)
    p = jnp.exp(s - m)
    denom = jnp.sum(p, axis=-1, keepdims=True)
    p = p * pl.reciprocal(denom, approx=True)
    out = jnp.dot(p.astype(v.dtype), v, preferred_element_type=jnp.float32)
    o_ref[0, 0] = out.astype(o_ref.dtype)


def pallas_attention(q, k, v):
    """q, k, v: [B, nh, S, dh] bf16 -> [B, nh, S, dh] bf16 (softmax(qk^T/sqrt(dh)) v)."""
    B, nh, S, dh = q.shape
    kernel = functools.partial(_attn_kernel, scale=1.0 / math.sqrt(dh))
    spec = pl.BlockSpec((1, 1, S, dh), lambda b, h: (b, h, 0, 0))
    return pl.pallas_call(
        kernel,
        out_shape=jax.ShapeDtypeStruct((B, nh, S, dh), q.dtype),
        grid=(B, nh),
        in_specs=[spec, spec, spec],
        out_specs=spec,
        compiler_params=pltpu.CompilerParams(
            dimension_semantics=("parallel", "parallel")),
    )(q, k, v)


# ----------------------------------------------------------------------------
# Quick-Thought head: ctx @ tgt^T, zero diagonal, log_softmax(dim=1)
# ----------------------------------------------------------------------------
def _qt_score_kernel(ctx_ref, tgt_ref, o_ref):
    ctx = ctx_ref[...]
    tgt = tgt_ref[...]
    scores = jax.lax.dot_general(ctx, tgt, (((1,), (1,)), ((), ())),
                                 preferred_element_type=jnp.float32)   # [B, B]
    B = scores.shape[0]
    row = jax.lax.broadcasted_iota(jnp.int32, (B, B), 0)
    col = jax.lax.broadcasted_iota(jnp.int32, (B, B), 1)
    scores = jnp.where(row == col, 0.0, scores)
    m = jnp.max(scores, axis=1, keepdims=True)
    e = jnp.exp(scores - m)
    s = jnp.sum(e, axis=1, keepdims=True)
    o_ref[...] = (scores - m - jnp.log(s)).astype(o_ref.dtype)


def pallas_quick_thought_head(ctx, tgt):
    """ctx, tgt: [B, H] pooled embeddings (bf16) -> [B, B] f32 log-probabilities."""
    B, H = ctx.shape
    return pl.pallas_call(
        _qt_score_kernel,
        out_shape=jax.ShapeDtypeStruct((B, B), jnp.float32),
        in_specs=[pl.BlockSpec((B, H), lambda: (0, 0)),
                  pl.BlockSpec((B, H), lambda: (0, 0))],
        out_specs=pl.BlockSpec((B, B), lambda: (0, 0)),
    )(ctx, tgt)


# ----------------------------------------------------------------------------
# Mini-BERT forward (plain-JAX glue only for embedding gather + first LN + reshapes)
# ----------------------------------------------------------------------------
def layer_norm(x, g, b, eps=1e-12):
    mu = jnp.mean(x, axis=-1, keepdims=True)
    var = jnp.mean((x - mu) ** 2, axis=-1, keepdims=True)
    return (x - mu) * jax.lax.rsqrt(var + eps) * g + b


def encoder_layer(p, h2, B, S, cfg):
    """h2: [B*S, H] bf16 -> [B*S, H] bf16."""
    H = cfg["hidden"]
    nh = cfg["heads"]
    dh = H // nh

    # Fused QKV projection: one [M, 3H] matmul instead of three [M, H] ones.
    qkv = pallas_linear(h2, p["qkv_w"], p["qkv_b"])                  # [B*S, 3H] bf16
    qkv = qkv.reshape(B, S, 3, nh, dh)
    q = qkv[:, :, 0].transpose(0, 2, 1, 3)                           # [B, nh, S, dh]
    k = qkv[:, :, 1].transpose(0, 2, 1, 3)
    v = qkv[:, :, 2].transpose(0, 2, 1, 3)

    ctx = pallas_attention(q, k, v)                                  # fused softmax attn
    ctx = ctx.transpose(0, 2, 1, 3).reshape(B * S, H)

    # Attention output projection + residual + LayerNorm, fused.
    h1 = pallas_linear(ctx, p["o_w"], p["o_b"],
                       residual=h2, ln_gamma=p["ln1_g"], ln_beta=p["ln1_b"])

    # FFN: intermediate (bias+GELU fused) then output (bias+residual+LN fused).
    inter = pallas_linear(h1, p["i_w"], p["i_b"], activation="gelu")
    h2_out = pallas_linear(inter, p["f_w"], p["f_b"],
                           residual=h1, ln_gamma=p["ln2_g"], ln_beta=p["ln2_b"])
    return h2_out


def bert_forward(params, input_ids, cfg):
    B, S = input_ids.shape
    H = cfg["hidden"]
    we = jnp.take(params["word_emb"], input_ids, axis=0)             # [B, S, H] f32
    pe = params["pos_emb"][:S][None, :, :]
    te = params["type_emb"][0][None, None, :]                        # token_type_ids == 0
    h = layer_norm(we + pe + te, params["emb_ln_g"], params["emb_ln_b"])
    h2 = h.reshape(B * S, H).astype(jnp.bfloat16)
    for lp in params["layers"]:
        h2 = encoder_layer(lp, h2, B, S, cfg)
    last_hidden = h2.reshape(B, S, H)
    cls = last_hidden[:, 0, :]                                       # [B, H] bf16
    pooled = pallas_linear(cls, params["pool_w"], params["pool_b"], activation="tanh")
    return last_hidden, pooled


def bert_se_forward(params, input_ids, cfg, is_eval=False):
    """BertSE.forward with is_lstm=False."""
    # TODO(synk): is_lstm=True path (bidirectional nn.LSTM over last hidden states)
    # has no clean Pallas equivalent here and is not implemented.
    _, pooled = bert_forward(params, input_ids, cfg)
    if is_eval:
        return pooled
    # ctx_seqs and tgt_seqs are both get_pooled_output(input_ids) -> identical.
    return pallas_quick_thought_head(pooled, pooled)


# ----------------------------------------------------------------------------
# Deterministic parameter init + bf16/fused-weight preparation
# ----------------------------------------------------------------------------
def init_params(key, cfg):
    H, I = cfg["hidden"], cfg["inter"]

    def nrm(k, shape):
        return (jax.random.normal(k, shape, jnp.float32) * 0.02).astype(jnp.float32)

    keys = iter(jax.random.split(key, 64))
    params = {
        "word_emb": nrm(next(keys), (cfg["vocab"], H)),
        "pos_emb": nrm(next(keys), (cfg["max_pos"], H)),
        "type_emb": nrm(next(keys), (2, H)),
        "emb_ln_g": jnp.ones((H,), jnp.float32),
        "emb_ln_b": jnp.zeros((H,), jnp.float32),
        "pool_w": nrm(next(keys), (H, H)),
        "pool_b": jnp.zeros((H,), jnp.float32),
        "layers": [],
    }
    for _ in range(cfg["layers"]):
        lp = {
            "q_w": nrm(next(keys), (H, H)), "q_b": jnp.zeros((H,), jnp.float32),
            "k_w": nrm(next(keys), (H, H)), "k_b": jnp.zeros((H,), jnp.float32),
            "v_w": nrm(next(keys), (H, H)), "v_b": jnp.zeros((H,), jnp.float32),
            "o_w": nrm(next(keys), (H, H)), "o_b": jnp.zeros((H,), jnp.float32),
            "ln1_g": jnp.ones((H,), jnp.float32), "ln1_b": jnp.zeros((H,), jnp.float32),
            "i_w": nrm(next(keys), (H, I)), "i_b": jnp.zeros((I,), jnp.float32),
            "f_w": nrm(next(keys), (I, H)), "f_b": jnp.zeros((H,), jnp.float32),
            "ln2_g": jnp.ones((H,), jnp.float32), "ln2_b": jnp.zeros((H,), jnp.float32),
        }
        params["layers"].append(lp)
    return params


def prepare_params(params):
    """One-time prep: fuse QKV weights and cast all matmul weights to bf16.

    Biases and LayerNorm gamma/beta stay f32 (VPU epilogue math is done in f32).
    """
    bf = jnp.bfloat16
    out = {
        "word_emb": params["word_emb"],
        "pos_emb": params["pos_emb"],
        "type_emb": params["type_emb"],
        "emb_ln_g": params["emb_ln_g"],
        "emb_ln_b": params["emb_ln_b"],
        "pool_w": params["pool_w"].astype(bf),
        "pool_b": params["pool_b"],
        "layers": [],
    }
    for lp in params["layers"]:
        out["layers"].append({
            "qkv_w": jnp.concatenate([lp["q_w"], lp["k_w"], lp["v_w"]], axis=1).astype(bf),
            "qkv_b": jnp.concatenate([lp["q_b"], lp["k_b"], lp["v_b"]]),
            "o_w": lp["o_w"].astype(bf), "o_b": lp["o_b"],
            "ln1_g": lp["ln1_g"], "ln1_b": lp["ln1_b"],
            "i_w": lp["i_w"].astype(bf), "i_b": lp["i_b"],
            "f_w": lp["f_w"].astype(bf), "f_b": lp["f_b"],
            "ln2_g": lp["ln2_g"], "ln2_b": lp["ln2_b"],
        })
    return out


# ----------------------------------------------------------------------------
# Main
# ----------------------------------------------------------------------------
if __name__ == "__main__":
    cfg = dict(vocab=100, hidden=32, heads=4, inter=64, layers=2, max_pos=16)
    B, S = 8, 8

    key = jax.random.PRNGKey(0)
    pkey, ikey = jax.random.split(key)
    params = prepare_params(init_params(pkey, cfg))
    input_ids = jax.random.randint(ikey, (B, S), 0, cfg["vocab"], dtype=jnp.int32)

    fwd = jax.jit(lambda p, ids: bert_se_forward(p, ids, cfg, is_eval=False))
    out = jax.block_until_ready(fwd(params, input_ids))

    assert out.shape == (B, B)
    assert bool(jnp.all(jnp.isfinite(out)))
    # Rows of log_softmax must exponentiate-sum to 1.
    assert bool(jnp.allclose(jnp.sum(jnp.exp(out), axis=1), 1.0, atol=1e-4))

    print("KERNEL_OK")
</pallas_src>

<mosaic_0001>
module attributes {stable_mosaic.version = 11 : i64} {
  func.func @_linear_kernel(%arg0: i32, %arg1: memref<64x32xbf16, #tpu.memory_space<vmem>>, %arg2: memref<32x96xbf16, #tpu.memory_space<vmem>>, %arg3: memref<1x96xf32, #tpu.memory_space<vmem>>, %arg4: memref<64x96xbf16, #tpu.memory_space<vmem>>) attributes {dimension_semantics = [#tpu.dimension_semantics<parallel>], iteration_bounds = array<i64: 1>, scalar_prefetch = 0 : i64, scratch_operands = 0 : i64, tpu.core_type = #tpu.core_type<tc>, window_params = [{transform_indices = @transform_0, window_bounds = array<i64: 64, 32>}, {pipeline_mode = #tpu.pipeline_mode<synchronous>, transform_indices = @transform_1, window_bounds = array<i64: 32, 96>}, {pipeline_mode = #tpu.pipeline_mode<synchronous>, transform_indices = @transform_2, window_bounds = array<i64: 1, 96>}, {transform_indices = @transform_3, window_bounds = array<i64: 64, 96>}]} {
    %c0 = arith.constant 0 : index
    %c0_0 = arith.constant 0 : index
    %0 = vector.load %arg1[%c0, %c0_0] : memref<64x32xbf16, #tpu.memory_space<vmem>>, vector<64x32xbf16>
    %c0_1 = arith.constant 0 : index
    %c0_2 = arith.constant 0 : index
    %1 = vector.load %arg2[%c0_1, %c0_2] : memref<32x96xbf16, #tpu.memory_space<vmem>>, vector<32x96xbf16>
    %cst = arith.constant dense<0.000000e+00> : vector<64x96xf32>
    %2 = tpu.matmul %0, %1, %cst {dimension_numbers = #tpu.dot_dimension_numbers<[1], [0], [0], [1], [0, 0, 1, 1], [], []>} : vector<64x32xbf16>, vector<32x96xbf16>, vector<64x96xf32> -> vector<64x96xf32>
    %c0_3 = arith.constant 0 : index
    %c0_4 = arith.constant 0 : index
    %3 = vector.load %arg3[%c0_3, %c0_4] : memref<1x96xf32, #tpu.memory_space<vmem>>, vector<1x96xf32>
    %4 = vector.broadcast %3 : vector<1x96xf32> to vector<64x96xf32>
    %5 = arith.addf %2, %4 : vector<64x96xf32>
    %6 = arith.truncf %5 : vector<64x96xf32> to vector<64x96xbf16>
    %c0_5 = arith.constant 0 : index
    %c0_6 = arith.constant 0 : index
    %7 = vector.load %arg4[%c0_5, %c0_6] : memref<64x96xbf16, #tpu.memory_space<vmem>>, vector<64x96xbf16>
    tpu.vector_store %arg4[%c0_5, %c0_6], %6 {strides = array<i32>} : memref<64x96xbf16, #tpu.memory_space<vmem>>, vector<64x96xbf16>,
    return
  }
  func.func @transform_0(%arg0: i32) -> (i32, i32) {
    %c0_i32 = arith.constant 0 : i32
    %c0_i32_0 = arith.constant 0 : i32
    return %arg0, %c0_i32 : i32, i32
  }
  func.func @transform_1(%arg0: i32) -> (i32, i32) {
    %c0_i32 = arith.constant 0 : i32
    %c0_i32_0 = arith.constant 0 : i32
    %c0_i32_1 = arith.constant 0 : i32
    return %c0_i32, %c0_i32_0 : i32, i32
  }
  func.func @transform_2(%arg0: i32) -> (i32, i32) {
    %c0_i32 = arith.constant 0 : i32
    %c0_i32_0 = arith.constant 0 : i32
    %c0_i32_1 = arith.constant 0 : i32
    return %c0_i32, %c0_i32_0 : i32, i32
  }
  func.func @transform_3(%arg0: i32) -> (i32, i32) {
    %c0_i32 = arith.constant 0 : i32
    %c0_i32_0 = arith.constant 0 : i32
    return %arg0, %c0_i32 : i32, i32
  }
}

module attributes {stable_mosaic.version = 11 : i64} {
  func.func @_attn_kernel(%arg0: i32, %arg1: i32, %arg2: memref<1x1x8x8xbf16, #tpu.memory_space<vmem>>, %arg3: memref<1x1x8x8xbf16, #tpu.memory_space<vmem>>, %arg4: memref<1x1x8x8xbf16, #tpu.memory_space<vmem>>, %arg5: memref<1x1x8x8xbf16, #tpu.memory_space<vmem>>) attributes {dimension_semantics = [#tpu.dimension_semantics<parallel>, #tpu.dimension_semantics<parallel>], iteration_bounds = array<i64: 8, 4>, scalar_prefetch = 0 : i64, scratch_operands = 0 : i64, tpu.core_type = #tpu.core_type<tc>, window_params = [{transform_indices = @transform_0, window_bounds = array<i64: 1, 1, 8, 8>}, {transform_indices = @transform_1, window_bounds = array<i64: 1, 1, 8, 8>}, {transform_indices = @transform_2, window_bounds = array<i64: 1, 1, 8, 8>}, {transform_indices = @transform_3, window_bounds = array<i64: 1, 1, 8, 8>}]} {
    %c0 = arith.constant 0 : index
    %c0_0 = arith.constant 0 : index
    %c0_1 = arith.constant 0 : index
    %c0_2 = arith.constant 0 : index
    %0 = vector.load %arg2[%c0, %c0_0, %c0_1, %c0_2] : memref<1x1x8x8xbf16, #tpu.memory_space<vmem>>, vector<1x1x8x8xbf16>
    %1 = vector.shape_cast %0 : vector<1x1x8x8xbf16> to vector<8x8xbf16>
    %c0_3 = arith.constant 0 : index
    %c0_4 = arith.constant 0 : index
    %c0_5 = arith.constant 0 : index
    %c0_6 = arith.constant 0 : index
    %2 = vector.load %arg3[%c0_3, %c0_4, %c0_5, %c0_6] : memref<1x1x8x8xbf16, #tpu.memory_space<vmem>>, vector<1x1x8x8xbf16>
    %3 = vector.shape_cast %2 : vector<1x1x8x8xbf16> to vector<8x8xbf16>
    %c0_7 = arith.constant 0 : index
    %c0_8 = arith.constant 0 : index
    %c0_9 = arith.constant 0 : index
    %c0_10 = arith.constant 0 : index
    %4 = vector.load %arg4[%c0_7, %c0_8, %c0_9, %c0_10] : memref<1x1x8x8xbf16, #tpu.memory_space<vmem>>, vector<1x1x8x8xbf16>
    %5 = vector.shape_cast %4 : vector<1x1x8x8xbf16> to vector<8x8xbf16>
    %cst = arith.constant dense<0.000000e+00> : vector<8x8xf32>
    %6 = tpu.matmul %1, %3, %cst {dimension_numbers = #tpu.dot_dimension_numbers<[1], [1], [0], [0], [0, 0, 1, 0], [], []>} : vector<8x8xbf16>, vector<8x8xbf16>, vector<8x8xf32> -> vector<8x8xf32>
    %cst_11 = arith.constant 0.353553385 : f32
    %7 = vector.broadcast %cst_11 : f32 to vector<8x8xf32>
    %8 = arith.mulf %6, %7 : vector<8x8xf32>
    %cst_12 = arith.constant dense<0xFF800000> : vector<8xf32>
    %9 = vector.multi_reduction <maximumf>, %8, %cst_12 [1] : vector<8x8xf32> to vector<8xf32>
    %10 = vector.shape_cast %9 : vector<8xf32> to vector<8x1xf32>
    %11 = vector.broadcast %10 : vector<8x1xf32> to vector<8x8xf32>
    %12 = arith.subf %8, %11 : vector<8x8xf32>
    %13 = math.exp %12 : vector<8x8xf32>
    %cst_13 = arith.constant dense<0.000000e+00> : vector<8xf32>
    %14 = vector.multi_reduction <add>, %13, %cst_13 [1] : vector<8x8xf32> to vector<8xf32>
    %15 = vector.shape_cast %14 : vector<8xf32> to vector<8x1xf32>
    %16 = tpu.reciprocal %15 {approx = true} : vector<8x1xf32> -> vector<8x1xf32>
    %17 = vector.broadcast %16 : vector<8x1xf32> to vector<8x8xf32>
    %18 = arith.mulf %13, %17 : vector<8x8xf32>
    %19 = arith.truncf %18 : vector<8x8xf32> to vector<8x8xbf16>
    %cst_14 = arith.constant dense<0.000000e+00> : vector<8x8xf32>
    %20 = tpu.matmul %19, %5, %cst_14 {dimension_numbers = #tpu.dot_dimension_numbers<[1], [0], [0], [1], [0, 0, 1, 1], [], []>} : vector<8x8xbf16>, vector<8x8xbf16>, vector<8x8xf32> -> vector<8x8xf32>
    %21 = arith.truncf %20 : vector<8x8xf32> to vector<8x8xbf16>
    %c0_15 = arith.constant 0 : index
    %c0_16 = arith.constant 0 : index
    %c0_17 = arith.constant 0 : index
    %c0_18 = arith.constant 0 : index
    %22 = vector.load %arg5[%c0_15, %c0_16, %c0_17, %c0_18] : memref<1x1x8x8xbf16, #tpu.memory_space<vmem>>, vector<1x1x8x8xbf16>
    %23 = vector.shape_cast %22 : vector<1x1x8x8xbf16> to vector<8x8xbf16>
    %24 = vector.shape_cast %21 : vector<8x8xbf16> to vector<1x1x8x8xbf16>
    tpu.vector_store %arg5[%c0_15, %c0_16, %c0_17, %c0_18], %24 {strides = array<i32>} : memref<1x1x8x8xbf16, #tpu.memory_space<vmem>>, vector<1x1x8x8xbf16>,
    return
  }
  func.func @transform_0(%arg0: i32, %arg1: i32) -> (i32, i32, i32, i32) {
    %c0_i32 = arith.constant 0 : i32
    %c0_i32_0 = arith.constant 0 : i32
    %c0_i32_1 = arith.constant 0 : i32
    return %arg0, %arg1, %c0_i32, %c0_i32_0 : i32, i32, i32, i32
  }
  func.func @transform_1(%arg0: i32, %arg1: i32) -> (i32, i32, i32, i32) {
    %c0_i32 = arith.constant 0 : i32
    %c0_i32_0 = arith.constant 0 : i32
    %c0_i32_1 = arith.constant 0 : i32
    return %arg0, %arg1, %c0_i32, %c0_i32_0 : i32, i32, i32, i32
  }
  func.func @transform_2(%arg0: i32, %arg1: i32) -> (i32, i32, i32, i32) {
    %c0_i32 = arith.constant 0 : i32
    %c0_i32_0 = arith.constant 0 : i32
    %c0_i32_1 = arith.constant 0 : i32
    return %arg0, %arg1, %c0_i32, %c0_i32_0 : i32, i32, i32, i32
  }
  func.func @transform_3(%arg0: i32, %arg1: i32) -> (i32, i32, i32, i32) {
    %c0_i32 = arith.constant 0 : i32
    %c0_i32_0 = arith.constant 0 : i32
    %c0_i32_1 = arith.constant 0 : i32
    return %arg0, %arg1, %c0_i32, %c0_i32_0 : i32, i32, i32, i32
  }
}

module attributes {stable_mosaic.version = 11 : i64} {
  func.func @_linear_res_ln_kernel(%arg0: i32, %arg1: memref<64x32xbf16, #tpu.memory_space<vmem>>, %arg2: memref<32x32xbf16, #tpu.memory_space<vmem>>, %arg3: memref<1x32xf32, #tpu.memory_space<vmem>>, %arg4: memref<64x32xbf16, #tpu.memory_space<vmem>>, %arg5: memref<1x32xf32, #tpu.memory_space<vmem>>, %arg6: memref<1x32xf32, #tpu.memory_space<vmem>>, %arg7: memref<64x32xbf16, #tpu.memory_space<vmem>>) attributes {dimension_semantics = [#tpu.dimension_semantics<parallel>], iteration_bounds = array<i64: 1>, scalar_prefetch = 0 : i64, scratch_operands = 0 : i64, tpu.core_type = #tpu.core_type<tc>, window_params = [{transform_indices = @transform_0, window_bounds = array<i64: 64, 32>}, {pipeline_mode = #tpu.pipeline_mode<synchronous>, transform_indices = @transform_1, window_bounds = array<i64: 32, 32>}, {pipeline_mode = #tpu.pipeline_mode<synchronous>, transform_indices = @transform_2, window_bounds = array<i64: 1, 32>}, {transform_indices = @transform_3, window_bounds = array<i64: 64, 32>}, {pipeline_mode = #tpu.pipeline_mode<synchronous>, transform_indices = @transform_4, window_bounds = array<i64: 1, 32>}, {pipeline_mode = #tpu.pipeline_mode<synchronous>, transform_indices = @transform_5, window_bounds = array<i64: 1, 32>}, {transform_indices = @transform_6, window_bounds = array<i64: 64, 32>}]} {
    %c0 = arith.constant 0 : index
    %c0_0 = arith.constant 0 : index
    %0 = vector.load %arg1[%c0, %c0_0] : memref<64x32xbf16, #tpu.memory_space<vmem>>, vector<64x32xbf16>
    %c0_1 = arith.constant 0 : index
    %c0_2 = arith.constant 0 : index
    %1 = vector.load %arg2[%c0_1, %c0_2] : memref<32x32xbf16, #tpu.memory_space<vmem>>, vector<32x32xbf16>
    %cst = arith.constant dense<0.000000e+00> : vector<64x32xf32>
    %2 = tpu.matmul %0, %1, %cst {dimension_numbers = #tpu.dot_dimension_numbers<[1], [0], [0], [1], [0, 0, 1, 1], [], []>} : vector<64x32xbf16>, vector<32x32xbf16>, vector<64x32xf32> -> vector<64x32xf32>
    %c0_3 = arith.constant 0 : index
    %c0_4 = arith.constant 0 : index
    %3 = vector.load %arg3[%c0_3, %c0_4] : memref<1x32xf32, #tpu.memory_space<vmem>>, vector<1x32xf32>
    %4 = vector.broadcast %3 : vector<1x32xf32> to vector<64x32xf32>
    %5 = arith.addf %2, %4 : vector<64x32xf32>
    %c0_5 = arith.constant 0 : index
    %c0_6 = arith.constant 0 : index
    %6 = vector.load %arg4[%c0_5, %c0_6] : memref<64x32xbf16, #tpu.memory_space<vmem>>, vector<64x32xbf16>
    %7 = arith.extf %6 : vector<64x32xbf16> to vector<64x32xf32>
    %8 = arith.addf %5, %7 : vector<64x32xf32>
    %cst_7 = arith.constant dense<0.000000e+00> : vector<64xf32>
    %9 = vector.multi_reduction <add>, %8, %cst_7 [1] : vector<64x32xf32> to vector<64xf32>
    %10 = vector.shape_cast %9 : vector<64xf32> to vector<64x1xf32>
    %cst_8 = arith.constant 3.200000e+01 : f32
    %11 = vector.broadcast %cst_8 : f32 to vector<64x1xf32>
    %12 = arith.divf %10, %11 : vector<64x1xf32>
    %13 = vector.broadcast %12 : vector<64x1xf32> to vector<64x32xf32>
    %14 = arith.subf %8, %13 : vector<64x32xf32>
    %15 = arith.mulf %14, %14 : vector<64x32xf32>
    %cst_9 = arith.constant dense<0.000000e+00> : vector<64xf32>
    %16 = vector.multi_reduction <add>, %15, %cst_9 [1] : vector<64x32xf32> to vector<64xf32>
    %17 = vector.shape_cast %16 : vector<64xf32> to vector<64x1xf32>
    %cst_10 = arith.constant 3.200000e+01 : f32
    %18 = vector.broadcast %cst_10 : f32 to vector<64x1xf32>
    %19 = arith.divf %17, %18 : vector<64x1xf32>
    %20 = vector.broadcast %12 : vector<64x1xf32> to vector<64x32xf32>
    %21 = arith.subf %8, %20 : vector<64x32xf32>
    %cst_11 = arith.constant 9.99999996E-13 : f32
    %22 = vector.broadcast %cst_11 : f32 to vector<64x1xf32>
    %23 = arith.addf %19, %22 : vector<64x1xf32>
    %24 = math.rsqrt %23 : vector<64x1xf32>
    %25 = vector.broadcast %24 : vector<64x1xf32> to vector<64x32xf32>
    %26 = arith.mulf %21, %25 : vector<64x32xf32>
    %c0_12 = arith.constant 0 : index
    %c0_13 = arith.constant 0 : index
    %27 = vector.load %arg5[%c0_12, %c0_13] : memref<1x32xf32, #tpu.memory_space<vmem>>, vector<1x32xf32>
    %28 = vector.broadcast %27 : vector<1x32xf32> to vector<64x32xf32>
    %29 = arith.mulf %26, %28 : vector<64x32xf32>
    %c0_14 = arith.constant 0 : index
    %c0_15 = arith.constant 0 : index
    %30 = vector.load %arg6[%c0_14, %c0_15] : memref<1x32xf32, #tpu.memory_space<vmem>>, vector<1x32xf32>
    %31 = vector.broadcast %30 : vector<1x32xf32> to vector<64x32xf32>
    %32 = arith.addf %29, %31 : vector<64x32xf32>
    %33 = arith.truncf %32 : vector<64x32xf32> to vector<64x32xbf16>
    %c0_16 = arith.constant 0 : index
    %c0_17 = arith.constant 0 : index
    %34 = vector.load %arg7[%c0_16, %c0_17] : memref<64x32xbf16, #tpu.memory_space<vmem>>, vector<64x32xbf16>
    tpu.vector_store %arg7[%c0_16, %c0_17], %33 {strides = array<i32>} : memref<64x32xbf16, #tpu.memory_space<vmem>>, vector<64x32xbf16>,
    return
  }
  func.func @transform_0(%arg0: i32) -> (i32, i32) {
    %c0_i32 = arith.constant 0 : i32
    %c0_i32_0 = arith.constant 0 : i32
    return %arg0, %c0_i32 : i32, i32
  }
  func.func @transform_1(%arg0: i32) -> (i32, i32) {
    %c0_i32 = arith.constant 0 : i32
    %c0_i32_0 = arith.constant 0 : i32
    %c0_i32_1 = arith.constant 0 : i32
    return %c0_i32, %c0_i32_0 : i32, i32
  }
  func.func @transform_2(%arg0: i32) -> (i32, i32) {
    %c0_i32 = arith.constant 0 : i32
    %c0_i32_0 = arith.constant 0 : i32
    %c0_i32_1 = arith.constant 0 : i32
    return %c0_i32, %c0_i32_0 : i32, i32
  }
  func.func @transform_3(%arg0: i32) -> (i32, i32) {
    %c0_i32 = arith.constant 0 : i32
    %c0_i32_0 = arith.constant 0 : i32
    return %arg0, %c0_i32 : i32, i32
  }
  func.func @transform_4(%arg0: i32) -> (i32, i32) {
    %c0_i32 = arith.constant 0 : i32
    %c0_i32_0 = arith.constant 0 : i32
    %c0_i32_1 = arith.constant 0 : i32
    return %c0_i32, %c0_i32_0 : i32, i32
  }
  func.func @transform_5(%arg0: i32) -> (i32, i32) {
    %c0_i32 = arith.constant 0 : i32
    %c0_i32_0 = arith.constant 0 : i32
    %c0_i32_1 = arith.constant 0 : i32
    return %c0_i32, %c0_i32_0 : i32, i32
  }
  func.func @transform_6(%arg0: i32) -> (i32, i32) {
    %c0_i32 = arith.constant 0 : i32
    %c0_i32_0 = arith.constant 0 : i32
    return %arg0, %c0_i32 : i32, i32
  }
}

module attributes {stable_mosaic.version = 11 : i64} {
  func.func @_linear_gelu_kernel(%arg0: i32, %arg1: memref<64x32xbf16, #tpu.memory_space<vmem>>, %arg2: memref<32x64xbf16, #tpu.memory_space<vmem>>, %arg3: memref<1x64xf32, #tpu.memory_space<vmem>>, %arg4: memref<64x64xbf16, #tpu.memory_space<vmem>>) attributes {dimension_semantics = [#tpu.dimension_semantics<parallel>], iteration_bounds = array<i64: 1>, scalar_prefetch = 0 : i64, scratch_operands = 0 : i64, tpu.core_type = #tpu.core_type<tc>, window_params = [{transform_indices = @transform_0, window_bounds = array<i64: 64, 32>}, {pipeline_mode = #tpu.pipeline_mode<synchronous>, transform_indices = @transform_1, window_bounds = array<i64: 32, 64>}, {pipeline_mode = #tpu.pipeline_mode<synchronous>, transform_indices = @transform_2, window_bounds = array<i64: 1, 64>}, {transform_indices = @transform_3, window_bounds = array<i64: 64, 64>}]} {
    %c0 = arith.constant 0 : index
    %c0_0 = arith.constant 0 : index
    %0 = vector.load %arg1[%c0, %c0_0] : memref<64x32xbf16, #tpu.memory_space<vmem>>, vector<64x32xbf16>
    %c0_1 = arith.constant 0 : index
    %c0_2 = arith.constant 0 : index
    %1 = vector.load %arg2[%c0_1, %c0_2] : memref<32x64xbf16, #tpu.memory_space<vmem>>, vector<32x64xbf16>
    %cst = arith.constant dense<0.000000e+00> : vector<64x64xf32>
    %2 = tpu.matmul %0, %1, %cst {dimension_numbers = #tpu.dot_dimension_numbers<[1], [0], [0], [1], [0, 0, 1, 1], [], []>} : vector<64x32xbf16>, vector<32x64xbf16>, vector<64x64xf32> -> vector<64x64xf32>
    %c0_3 = arith.constant 0 : index
    %c0_4 = arith.constant 0 : index
    %3 = vector.load %arg3[%c0_3, %c0_4] : memref<1x64xf32, #tpu.memory_space<vmem>>, vector<1x64xf32>
    %4 = vector.broadcast %3 : vector<1x64xf32> to vector<64x64xf32>
    %5 = arith.addf %2, %4 : vector<64x64xf32>
    %cst_5 = arith.constant 5.000000e-01 : f32
    %6 = vector.broadcast %cst_5 : f32 to vector<64x64xf32>
    %7 = arith.mulf %6, %5 : vector<64x64xf32>
    %cst_6 = arith.constant 4.471500e-02 : f32
    %8 = vector.broadcast %cst_6 : f32 to vector<64x64xf32>
    %9 = arith.mulf %8, %5 : vector<64x64xf32>
    %10 = arith.mulf %9, %5 : vector<64x64xf32>
    %11 = arith.mulf %10, %5 : vector<64x64xf32>
    %12 = arith.addf %5, %11 : vector<64x64xf32>
    %cst_7 = arith.constant 0.797884583 : f32
    %13 = vector.broadcast %cst_7 : f32 to vector<64x64xf32>
    %14 = arith.mulf %13, %12 : vector<64x64xf32>
    %15 = math.tanh %14 : vector<64x64xf32>
    %cst_8 = arith.constant 1.000000e+00 : f32
    %16 = vector.broadcast %cst_8 : f32 to vector<64x64xf32>
    %17 = arith.addf %16, %15 : vector<64x64xf32>
    %18 = arith.mulf %7, %17 : vector<64x64xf32>
    %19 = arith.truncf %18 : vector<64x64xf32> to vector<64x64xbf16>
    %c0_9 = arith.constant 0 : index
    %c0_10 = arith.constant 0 : index
    %20 = vector.load %arg4[%c0_9, %c0_10] : memref<64x64xbf16, #tpu.memory_space<vmem>>, vector<64x64xbf16>
    tpu.vector_store %arg4[%c0_9, %c0_10], %19 {strides = array<i32>} : memref<64x64xbf16, #tpu.memory_space<vmem>>, vector<64x64xbf16>,
    return
  }
  func.func @transform_0(%arg0: i32) -> (i32, i32) {
    %c0_i32 = arith.constant 0 : i32
    %c0_i32_0 = arith.constant 0 : i32
    return %arg0, %c0_i32 : i32, i32
  }
  func.func @transform_1(%arg0: i32) -> (i32, i32) {
    %c0_i32 = arith.constant 0 : i32
    %c0_i32_0 = arith.constant 0 : i32
    %c0_i32_1 = arith.constant 0 : i32
    return %c0_i32, %c0_i32_0 : i32, i32
  }
  func.func @transform_2(%arg0: i32) -> (i32, i32) {
    %c0_i32 = arith.constant 0 : i32
    %c0_i32_0 = arith.constant 0 : i32
    %c0_i32_1 = arith.constant 0 : i32
    return %c0_i32, %c0_i32_0 : i32, i32
  }
  func.func @transform_3(%arg0: i32) -> (i32, i32) {
    %c0_i32 = arith.constant 0 : i32
    %c0_i32_0 = arith.constant 0 : i32
    return %arg0, %c0_i32 : i32, i32
  }
}

module attributes {stable_mosaic.version = 11 : i64} {
  func.func @_linear_res_ln_kernel(%arg0: i32, %arg1: memref<64x64xbf16, #tpu.memory_space<vmem>>, %arg2: memref<64x32xbf16, #tpu.memory_space<vmem>>, %arg3: memref<1x32xf32, #tpu.memory_space<vmem>>, %arg4: memref<64x32xbf16, #tpu.memory_space<vmem>>, %arg5: memref<1x32xf32, #tpu.memory_space<vmem>>, %arg6: memref<1x32xf32, #tpu.memory_space<vmem>>, %arg7: memref<64x32xbf16, #tpu.memory_space<vmem>>) attributes {dimension_semantics = [#tpu.dimension_semantics<parallel>], iteration_bounds = array<i64: 1>, scalar_prefetch = 0 : i64, scratch_operands = 0 : i64, tpu.core_type = #tpu.core_type<tc>, window_params = [{transform_indices = @transform_0, window_bounds = array<i64: 64, 64>}, {pipeline_mode = #tpu.pipeline_mode<synchronous>, transform_indices = @transform_1, window_bounds = array<i64: 64, 32>}, {pipeline_mode = #tpu.pipeline_mode<synchronous>, transform_indices = @transform_2, window_bounds = array<i64: 1, 32>}, {transform_indices = @transform_3, window_bounds = array<i64: 64, 32>}, {pipeline_mode = #tpu.pipeline_mode<synchronous>, transform_indices = @transform_4, window_bounds = array<i64: 1, 32>}, {pipeline_mode = #tpu.pipeline_mode<synchronous>, transform_indices = @transform_5, window_bounds = array<i64: 1, 32>}, {transform_indices = @transform_6, window_bounds = array<i64: 64, 32>}]} {
    %c0 = arith.constant 0 : index
    %c0_0 = arith.constant 0 : index
    %0 = vector.load %arg1[%c0, %c0_0] : memref<64x64xbf16, #tpu.memory_space<vmem>>, vector<64x64xbf16>
    %c0_1 = arith.constant 0 : index
    %c0_2 = arith.constant 0 : index
    %1 = vector.load %arg2[%c0_1, %c0_2] : memref<64x32xbf16, #tpu.memory_space<vmem>>, vector<64x32xbf16>
    %cst = arith.constant dense<0.000000e+00> : vector<64x32xf32>
    %2 = tpu.matmul %0, %1, %cst {dimension_numbers = #tpu.dot_dimension_numbers<[1], [0], [0], [1], [0, 0, 1, 1], [], []>} : vector<64x64xbf16>, vector<64x32xbf16>, vector<64x32xf32> -> vector<64x32xf32>
    %c0_3 = arith.constant 0 : index
    %c0_4 = arith.constant 0 : index
    %3 = vector.load %arg3[%c0_3, %c0_4] : memref<1x32xf32, #tpu.memory_space<vmem>>, vector<1x32xf32>
    %4 = vector.broadcast %3 : vector<1x32xf32> to vector<64x32xf32>
    %5 = arith.addf %2, %4 : vector<64x32xf32>
    %c0_5 = arith.constant 0 : index
    %c0_6 = arith.constant 0 : index
    %6 = vector.load %arg4[%c0_5, %c0_6] : memref<64x32xbf16, #tpu.memory_space<vmem>>, vector<64x32xbf16>
    %7 = arith.extf %6 : vector<64x32xbf16> to vector<64x32xf32>
    %8 = arith.addf %5, %7 : vector<64x32xf32>
    %cst_7 = arith.constant dense<0.000000e+00> : vector<64xf32>
    %9 = vector.multi_reduction <add>, %8, %cst_7 [1] : vector<64x32xf32> to vector<64xf32>
    %10 = vector.shape_cast %9 : vector<64xf32> to vector<64x1xf32>
    %cst_8 = arith.constant 3.200000e+01 : f32
    %11 = vector.broadcast %cst_8 : f32 to vector<64x1xf32>
    %12 = arith.divf %10, %11 : vector<64x1xf32>
    %13 = vector.broadcast %12 : vector<64x1xf32> to vector<64x32xf32>
    %14 = arith.subf %8, %13 : vector<64x32xf32>
    %15 = arith.mulf %14, %14 : vector<64x32xf32>
    %cst_9 = arith.constant dense<0.000000e+00> : vector<64xf32>
    %16 = vector.multi_reduction <add>, %15, %cst_9 [1] : vector<64x32xf32> to vector<64xf32>
    %17 = vector.shape_cast %16 : vector<64xf32> to vector<64x1xf32>
    %cst_10 = arith.constant 3.200000e+01 : f32
    %18 = vector.broadcast %cst_10 : f32 to vector<64x1xf32>
    %19 = arith.divf %17, %18 : vector<64x1xf32>
    %20 = vector.broadcast %12 : vector<64x1xf32> to vector<64x32xf32>
    %21 = arith.subf %8, %20 : vector<64x32xf32>
    %cst_11 = arith.constant 9.99999996E-13 : f32
    %22 = vector.broadcast %cst_11 : f32 to vector<64x1xf32>
    %23 = arith.addf %19, %22 : vector<64x1xf32>
    %24 = math.rsqrt %23 : vector<64x1xf32>
    %25 = vector.broadcast %24 : vector<64x1xf32> to vector<64x32xf32>
    %26 = arith.mulf %21, %25 : vector<64x32xf32>
    %c0_12 = arith.constant 0 : index
    %c0_13 = arith.constant 0 : index
    %27 = vector.load %arg5[%c0_12, %c0_13] : memref<1x32xf32, #tpu.memory_space<vmem>>, vector<1x32xf32>
    %28 = vector.broadcast %27 : vector<1x32xf32> to vector<64x32xf32>
    %29 = arith.mulf %26, %28 : vector<64x32xf32>
    %c0_14 = arith.constant 0 : index
    %c0_15 = arith.constant 0 : index
    %30 = vector.load %arg6[%c0_14, %c0_15] : memref<1x32xf32, #tpu.memory_space<vmem>>, vector<1x32xf32>
    %31 = vector.broadcast %30 : vector<1x32xf32> to vector<64x32xf32>
    %32 = arith.addf %29, %31 : vector<64x32xf32>
    %33 = arith.truncf %32 : vector<64x32xf32> to vector<64x32xbf16>
    %c0_16 = arith.constant 0 : index
    %c0_17 = arith.constant 0 : index
    %34 = vector.load %arg7[%c0_16, %c0_17] : memref<64x32xbf16, #tpu.memory_space<vmem>>, vector<64x32xbf16>
    tpu.vector_store %arg7[%c0_16, %c0_17], %33 {strides = array<i32>} : memref<64x32xbf16, #tpu.memory_space<vmem>>, vector<64x32xbf16>,
    return
  }
  func.func @transform_0(%arg0: i32) -> (i32, i32) {
    %c0_i32 = arith.constant 0 : i32
    %c0_i32_0 = arith.constant 0 : i32
    return %arg0, %c0_i32 : i32, i32
  }
  func.func @transform_1(%arg0: i32) -> (i32, i32) {
    %c0_i32 = arith.constant 0 : i32
    %c0_i32_0 = arith.constant 0 : i32
    %c0_i32_1 = arith.constant 0 : i32
    return %c0_i32, %c0_i32_0 : i32, i32
  }
  func.func @transform_2(%arg0: i32) -> (i32, i32) {
    %c0_i32 = arith.constant 0 : i32
    %c0_i32_0 = arith.constant 0 : i32
    %c0_i32_1 = arith.constant 0 : i32
    return %c0_i32, %c0_i32_0 : i32, i32
  }
  func.func @transform_3(%arg0: i32) -> (i32, i32) {
    %c0_i32 = arith.constant 0 : i32
    %c0_i32_0 = arith.constant 0 : i32
    return %arg0, %c0_i32 : i32, i32
  }
  func.func @transform_4(%arg0: i32) -> (i32, i32) {
    %c0_i32 = arith.constant 0 : i32
    %c0_i32_0 = arith.constant 0 : i32
    %c0_i32_1 = arith.constant 0 : i32
    return %c0_i32, %c0_i32_0 : i32, i32
  }
  func.func @transform_5(%arg0: i32) -> (i32, i32) {
    %c0_i32 = arith.constant 0 : i32
    %c0_i32_0 = arith.constant 0 : i32
    %c0_i32_1 = arith.constant 0 : i32
    return %c0_i32, %c0_i32_0 : i32, i32
  }
  func.func @transform_6(%arg0: i32) -> (i32, i32) {
    %c0_i32 = arith.constant 0 : i32
    %c0_i32_0 = arith.constant 0 : i32
    return %arg0, %c0_i32 : i32, i32
  }
}

module attributes {stable_mosaic.version = 11 : i64} {
  func.func @_qt_score_kernel(%arg0: memref<8x32xbf16, #tpu.memory_space<vmem>>, %arg1: memref<8x32xbf16, #tpu.memory_space<vmem>>, %arg2: memref<8x8xf32, #tpu.memory_space<vmem>>) attributes {dimension_semantics = [], scalar_prefetch = 0 : i64, scratch_operands = 0 : i64, tpu.core_type = #tpu.core_type<tc>} {
    %c0 = arith.constant 0 : index
    %c0_0 = arith.constant 0 : index
    %0 = vector.load %arg0[%c0, %c0_0] : memref<8x32xbf16, #tpu.memory_space<vmem>>, vector<8x32xbf16>
    %c0_1 = arith.constant 0 : index
    %c0_2 = arith.constant 0 : index
    %1 = vector.load %arg1[%c0_1, %c0_2] : memref<8x32xbf16, #tpu.memory_space<vmem>>, vector<8x32xbf16>
    %cst = arith.constant dense<0.000000e+00> : vector<8x8xf32>
    %2 = tpu.matmul %0, %1, %cst {dimension_numbers = #tpu.dot_dimension_numbers<[1], [1], [0], [0], [0, 0, 1, 0], [], []>} : vector<8x32xbf16>, vector<8x32xbf16>, vector<8x8xf32> -> vector<8x8xf32>
    %3 = tpu.iota {dimensions = array<i32: 0>} : vector<8x8xi32>
    %4 = tpu.iota {dimensions = array<i32: 1>} : vector<8x8xi32>
    %5 = arith.cmpi eq, %3, %4 : vector<8x8xi32>
    %cst_3 = arith.constant 0.000000e+00 : f32
    %6 = vector.broadcast %cst_3 : f32 to vector<8x8xf32>
    %7 = arith.select %5, %6, %2 : vector<8x8xi1>, vector<8x8xf32>
    %cst_4 = arith.constant dense<0xFF800000> : vector<8xf32>
    %8 = vector.multi_reduction <maximumf>, %7, %cst_4 [1] : vector<8x8xf32> to vector<8xf32>
    %9 = vector.shape_cast %8 : vector<8xf32> to vector<8x1xf32>
    %10 = vector.broadcast %9 : vector<8x1xf32> to vector<8x8xf32>
    %11 = arith.subf %7, %10 : vector<8x8xf32>
    %12 = math.exp %11 : vector<8x8xf32>
    %cst_5 = arith.constant dense<0.000000e+00> : vector<8xf32>
    %13 = vector.multi_reduction <add>, %12, %cst_5 [1] : vector<8x8xf32> to vector<8xf32>
    %14 = vector.shape_cast %13 : vector<8xf32> to vector<8x1xf32>
    %15 = vector.broadcast %9 : vector<8x1xf32> to vector<8x8xf32>
    %16 = arith.subf %7, %15 : vector<8x8xf32>
    %17 = math.log %14 : vector<8x1xf32>
    %18 = vector.broadcast %17 : vector<8x1xf32> to vector<8x8xf32>
    %19 = arith.subf %16, %18 : vector<8x8xf32>
    %c0_6 = arith.constant 0 : index
    %c0_7 = arith.constant 0 : index
    %20 = vector.load %arg2[%c0_6, %c0_7] : memref<8x8xf32, #tpu.memory_space<vmem>>, vector<8x8xf32>
    tpu.vector_store %arg2[%c0_6, %c0_7], %19 {strides = array<i32>} : memref<8x8xf32, #tpu.memory_space<vmem>>, vector<8x8xf32>,
    return
  }
}

module attributes {stable_mosaic.version = 11 : i64} {
  func.func @_linear_tanh_kernel(%arg0: i32, %arg1: memref<8x32xbf16, #tpu.memory_space<vmem>>, %arg2: memref<32x32xbf16, #tpu.memory_space<vmem>>, %arg3: memref<1x32xf32, #tpu.memory_space<vmem>>, %arg4: memref<8x32xbf16, #tpu.memory_space<vmem>>) attributes {dimension_semantics = [#tpu.dimension_semantics<parallel>], iteration_bounds = array<i64: 1>, scalar_prefetch = 0 : i64, scratch_operands = 0 : i64, tpu.core_type = #tpu.core_type<tc>, window_params = [{transform_indices = @transform_0, window_bounds = array<i64: 8, 32>}, {pipeline_mode = #tpu.pipeline_mode<synchronous>, transform_indices = @transform_1, window_bounds = array<i64: 32, 32>}, {pipeline_mode = #tpu.pipeline_mode<synchronous>, transform_indices = @transform_2, window_bounds = array<i64: 1, 32>}, {transform_indices = @transform_3, window_bounds = array<i64: 8, 32>}]} {
    %c0 = arith.constant 0 : index
    %c0_0 = arith.constant 0 : index
    %0 = vector.load %arg1[%c0, %c0_0] : memref<8x32xbf16, #tpu.memory_space<vmem>>, vector<8x32xbf16>
    %c0_1 = arith.constant 0 : index
    %c0_2 = arith.constant 0 : index
    %1 = vector.load %arg2[%c0_1, %c0_2] : memref<32x32xbf16, #tpu.memory_space<vmem>>, vector<32x32xbf16>
    %cst = arith.constant dense<0.000000e+00> : vector<8x32xf32>
    %2 = tpu.matmul %0, %1, %cst {dimension_numbers = #tpu.dot_dimension_numbers<[1], [0], [0], [1], [0, 0, 1, 1], [], []>} : vector<8x32xbf16>, vector<32x32xbf16>, vector<8x32xf32> -> vector<8x32xf32>
    %c0_3 = arith.constant 0 : index
    %c0_4 = arith.constant 0 : index
    %3 = vector.load %arg3[%c0_3, %c0_4] : memref<1x32xf32, #tpu.memory_space<vmem>>, vector<1x32xf32>
    %4 = vector.broadcast %3 : vector<1x32xf32> to vector<8x32xf32>
    %5 = arith.addf %2, %4 : vector<8x32xf32>
    %6 = math.tanh %5 : vector<8x32xf32>
    %7 = arith.truncf %6 : vector<8x32xf32> to vector<8x32xbf16>
    %c0_5 = arith.constant 0 : index
    %c0_6 = arith.constant 0 : index
    %8 = vector.load %arg4[%c0_5, %c0_6] : memref<8x32xbf16, #tpu.memory_space<vmem>>, vector<8x32xbf16>
    tpu.vector_store %arg4[%c0_5, %c0_6], %7 {strides = array<i32>} : memref<8x32xbf16, #tpu.memory_space<vmem>>, vector<8x32xbf16>,
    return
  }
  func.func @transform_0(%arg0: i32) -> (i32, i32) {
    %c0_i32 = arith.constant 0 : i32
    %c0_i32_0 = arith.constant 0 : i32
    return %arg0, %c0_i32 : i32, i32
  }
  func.func @transform_1(%arg0: i32) -> (i32, i32) {
    %c0_i32 = arith.constant 0 : i32
    %c0_i32_0 = arith.constant 0 : i32
    %c0_i32_1 = arith.constant 0 : i32
    return %c0_i32, %c0_i32_0 : i32, i32
  }
  func.func @transform_2(%arg0: i32) -> (i32, i32) {
    %c0_i32 = arith.constant 0 : i32
    %c0_i32_0 = arith.constant 0 : i32
    %c0_i32_1 = arith.constant 0 : i32
    return %c0_i32, %c0_i32_0 : i32, i32
  }
  func.func @transform_3(%arg0: i32) -> (i32, i32) {
    %c0_i32 = arith.constant 0 : i32
    %c0_i32_0 = arith.constant 0 : i32
    return %arg0, %c0_i32 : i32, i32
  }
}

</mosaic_0001>

<bundles_post_ra>
// kernel: _lambda_.13
= control target key start
LH: loop header
LB: loop body
LE: loop exit
PB: predicated region body
PF: predicated region fallthrough
CT: control target
= control target key end

     0   :  { %s641_s12 = smov 0   ;;  %s643_s13 = smov 0   ;;  %s709_s0 = inlined_call_operand.vmem [shape: bf16[8,4,8,8], index: 0, kind: input, shape index: {}]   ;;  %s710_s1 = inlined_call_operand.vmem [shape: bf16[8,4,8,8], index: 1, kind: input, shape index: {}]   ;;  %s711_s2 = inlined_call_operand.vmem [shape: bf16[8,4,8,8], index: 2, kind: input, shape index: {}]   ;;  %s712_s3 = inlined_call_operand.vmem [shape: bf16[8,4,8,8], index: 3, kind: output, shape index: {}]  }
   0x1   :  { %s645_s14 = smov 0   ;;  %s647_s15 = smov 0  }
   0x2   :  { %s649_s16 = smov 0  }
   0x3 LB: > { %s22_s17 = sadd.s32 1, %s609_s14  ;;  %s25_s18 = sadd.s32 1, %s613_s15  ;;  %s617_s16 = sphi %s649_s16, %s13_s16   ;;  %s613_s15 = sphi %s647_s15, %s716_s15   ;;  %s609_s14 = sphi %s645_s14, %s715_s14   ;;  %s605_s13 = sphi %s643_s13, %s714_s13   ;;  %s601_s12 = sphi %s641_s12, %s713_s12  }
   0x4   : > { %p23_p0 = scmp.ge.s32.totalorder %s22_s17, 4  ;;  %p504_p1 = scmp.ge.s32.totalorder %s617_s16, 1 }
   0x5   : > { %p186_p2 = scmp.lt.s32.totalorder %s617_s16, 33 }
   0x6   : > { %s718_s17 = smov (%p23_p0, %s22_s17), 0  ;;  %s720_s18 = smov (!%p23_p0, %s25_s18), %s613_s15 }
   0x7   : > { %p187_p3 = pnand %p504_p1, %p186_p2  ;;  %p27_p4 = scmp.ge.s32.totalorder %s720_s18, 8 }
   0x8   : > { %p232_p5 = scmp.lt.s32.totalorder (!%p187_p3), %s605_s13, 7  ;;  %p234_p6 = scmp.lt.s32.totalorder (!%p187_p3), %s601_s12, 3  ;;  %v619_v0 = vmov (!%p187_p3), 0.0   ;;  %vm620_vm0 = vmmov (!%p187_p3), 0   ;;  %vm268_vm1 = vcmask (!%p187_p3), 64512   ;;  %vm331_vm2 = vcmask (!%p187_p3), 1043456  }
   0x9   : > { %s722_s18 = smov (%p27_p4, %s720_s18), 0  ;;  %190 = sbr.rel (%p187_p3) target bundleno = 775 (0x307), region = 32 }
   0xa   : > { %521 = vmatprep.subr.bf16.mxu0 (!%p187_p3), %v619_v0  ;;  %523 = vmatprep.mubr.msk.bf16.mxu0 (!%p187_p3), %vm620_vm0, %v619_v0  ;;  %vm376_vm3 = vcmask (!%p187_p3), 60416  }
   0xb   : > { %527 = vmatprep.subr.bf16.mxu1 (!%p187_p3), %v619_v0  ;;  %529 = vmatprep.mubr.msk.bf16.mxu1 (!%p187_p3), %vm620_vm0, %v619_v0 }
  0x10   : > { %s724_s13 = smov (!%p232_p5, %s605_s13), 7  ;;  %s726_s12 = smov (!%p234_p6, %s601_s12), 3 }
  0x11   : > { %s505_s19 = sshll.u32 %s724_s13, 2 }
  0x12   : > { %s237_s20 = sadd.s32 %s505_s19, %s726_s12 }
  0x13   : > { %s671_s21 = sshll.u32 %s237_s20, 2 }
  0x14   : > { %s247_s24 = scalar_lea.vmem %s710_s1, %s671_s21  ;;  %s239_s27 = scalar_lea.vmem %s709_s0, %s671_s21 }
  0x15   : > { %v266_v1 = vld [vmem:[%s247_s24] sm:$0xf]  ;;  %s255_s30 = scalar_lea.vmem %s711_s2, %s671_s21  ;;  %s263_s6 = scalar_lea.vmem %s712_s3, %s671_s21 }
  0x16   : > { %v273_v2 = vsel %vm268_vm1, %v266_v1, 0  ;;  %v265_v3 = vld [vmem:[%s239_s27] sm:$0xf] }
  0x17   : > { %522 = vmatpush3.bf16.xpose.msra.mxu0 %v273_v2  ;;  %v267_v15 = vld [vmem:[%s255_s30] sm:$0xf] }
  0x18   : > { %v333_v16 = vsel %vm331_vm2, %v267_v15, 0 }
  0x19   : > { %528 = vmatpush3.bf16.msra.mxu1 %v333_v16 }
  0x1e   : > { %524 = vmatmul.mubr.msk.bf16.vlgmr.msra.gmra.mrb[0].mxu0 %vm268_vm1, %v265_v3 }
  0xf1   : > { %v309_v4 = vpop.f32.mrb[0].mxu0 }
  0xf2   : > { %v315_v5 = vmul.f32 0.35355338, %v309_v4  ;;  %v525_v6 = vpop.f32.mrb[1].mxu0 }
  0xf3   : > { %v312_v7 = vpop.f32.mrb[2].mxu0 }
  0xf4   : > { %v526_v8 = vpop.f32.mrb[3].mxu0  ;;  %v316_v9 = vsel %vm268_vm1, %v315_v5, -inf }
  0xf5   : > { %317 = vmax.xlane.f32.xlu0 %v316_v9 }
 0x182   : > { %v318_v10 = vpop.xlane.xlu0 %317 }
 0x183   : > { %v319_v11 = vsub.f32 %v315_v5, %v318_v10 }
 0x185   : > { %v320_v12 = vmul.f32 1.442695, %v319_v11 }
 0x187   : > { %575 = vpow2.f32 %v320_v12 }
 0x191   : > { %v576_v13 = vpop.eup %575 }
 0x192   : > { %v322_v14 = vsel %vm268_vm1, %v576_v13, 0.0 }
 0x193   : > { %323 = vadd.xlane.f32.xlu0 %v322_v14 }
 0x220   : > { %v324_v17 = vpop.xlane.xlu0 %323 }
 0x221   : > { %577 = vrcp.f32 %v324_v17 }
 0x22b   : > { %v578_v18 = vpop.eup %577 }
 0x22c   : > { %v326_v19 = vmul.f32 %v578_v18, %v576_v13 }
 0x22e   : > { %v327_v20 = vpack.c.bf16 %v326_v19, %v326_v19 }
 0x230   : > { %530 = vmatmul.mubr.msk.bf16.vlgmr.msra.gmra.mrb[0].mxu1 %vm268_vm1, %v327_v20 }
 0x303   : > { %v369_v21 = vpop.f32.mrb[0].mxu1 }
 0x304   : > { %v375_v22 = vpack.c.bf16 %v369_v21, %v369_v21  ;;  %v531_v23 = vpop.f32.mrb[1].mxu1 }
 0x305   : > { %v372_v24 = vpop.f32.mrb[2].mxu1 }
 0x306   : > { %377 = vst.msk [vmem:[%s263_s6] sm:$0xf] %vm376_vm3, %v375_v22  ;;  %v532_v25 = vpop.f32.mrb[3].mxu1 }
 0x307 PF: > { %s13_s16 = sadd.s32 1, %s617_s16   ;;  %s713_s12 = smov %s609_s14 }
 0x308   : > { %p10_p7 = scmp.ge.s32.totalorder %s13_s16, 34   ;;  %s714_s13 = smov %s613_s15 }
 0x309   : > { %s715_s14 = smov %s718_s17  ;;  %s716_s15 = smov %s722_s18 }
 0x30a   :  { %12 = sbr.rel (!%p10_p7) target bundleno = 3 (0x3), region = 68 }

// kernel: _lambda_.12
= control target key start
LH: loop header
LB: loop body
LE: loop exit
PB: predicated region body
PF: predicated region fallthrough
CT: control target
= control target key end

     0   :  { %vm66_vm0 = vcmask 261120   ;;  %vm176_vm1 = vcmask 781312   ;;  %s317_s1 = inlined_call_operand.vmem [shape: bf16[32,96], index: 1, kind: input, shape index: {}]   ;;  %s318_s0 = inlined_call_operand.vmem [shape: bf16[64,32], index: 0, kind: input, shape index: {}]   ;;  %s319_s2 = inlined_call_operand.vmem [shape: f32[1,96], index: 2, kind: input, shape index: {}]   ;;  %s320_s3 = inlined_call_operand.vmem [shape: bf16[64,96], index: 3, kind: output, shape index: {}]  }
   0x1   :  { %v238_v0 = vld [vmem:[%s317_s1] sm:$0xff]   ;;  %v239_v1 = vld [vmem:[%s317_s1 + $0x8] sm:$0xff]   ;;  %v241_v3 = vld [vmem:[%s318_s0 + $0x10] sm:$0xff]  }
   0x2   :  { %222 = vmatprep.subr.bf16.mxu0 %v238_v0  ;;  %234 = vmatprep.subr.bf16.mxu1 %v238_v0  ;;  %v240_v2 = vld [vmem:[%s318_s0] sm:$0xff]   ;;  %v242_v4 = vld [vmem:[%s318_s0 + $0x8] sm:$0xff]   ;;  %v243_v5 = vld [vmem:[%s318_s0 + $0x18] sm:$0xff]  }
   0x3   :  { %223 = vmatpush3.bf16.msra.mxu0 %v238_v0  ;;  %236 = vmatpush3.bf16.msra.mxu1 %v238_v0  ;;  %v189_v6 = vld [vmem:[%s319_s2] ss:$0 sm:$0xff] }
   0x4   :  { %224 = vmatprep.subr.bf16.mxu0 %v239_v1  ;;  %235 = vmatprep.subr.bf16.mxu1 %v239_v1 }
   0x5   :  { %226 = vmatprep.mubr.msk.bf16.mxu0 %vm66_vm0, %v240_v2  ;;  %230 = vmatprep.mubr.msk.bf16.mxu1 %vm66_vm0, %v241_v3 }
   0x7   :  { %225 = vmatpush3.bf16.msra.mxu0 %v239_v1  ;;  %237 = vmatpush3.bf16.msra.mxu1 %v239_v1 }
   0xa   :  { %227 = vmatmul.mubr.msk.bf16.vlgmr.msra.gmra.mrb[0].mxu0 %vm66_vm0, %v242_v4  ;;  %231 = vmatmul.mubr.msk.bf16.vlgmr.msra.gmra.mrb[0].mxu1 %vm66_vm0, %v243_v5 }
  0xdd   :  { %v228_v7 = vpop.f32.mrb[0].mxu0  ;;  %v232_v8 = vpop.f32.mrb[0].mxu1 }
  0xde   :  { %v122_v9 = vadd.f32 %v228_v7, %v189_v6  ;;  %v138_v10 = vadd.f32 %v232_v8, %v189_v6  ;;  %v113_v11 = vpop.f32.mrb[1].mxu0  ;;  %v129_v12 = vpop.f32.mrb[1].mxu1 }
  0xdf   :  { %v114_v13 = vadd.f32 %v189_v6, %v113_v11  ;;  %v130_v14 = vadd.f32 %v189_v6, %v129_v12  ;;  %v229_v15 = vpop.f32.mrb[2].mxu0  ;;  %v233_v16 = vpop.f32.mrb[2].mxu1 }
  0xe0   :  { %v210_v17 = vpack.c.bf16 %v122_v9, %v122_v9  ;;  %v214_v18 = vpack.c.bf16 %v138_v10, %v138_v10  ;;  %v125_v19 = vadd.f32 %v229_v15, %v189_v6  ;;  %v141_v20 = vadd.f32 %v233_v16, %v189_v6  ;;  %v116_v21 = vpop.f32.mrb[3].mxu0  ;;  %v132_v22 = vpop.f32.mrb[3].mxu1 }
  0xe1   :  { %v208_v23 = vpack.c.bf16 %v114_v13, %v114_v13  ;;  %v212_v24 = vpack.c.bf16 %v130_v14, %v130_v14  ;;  %v117_v25 = vadd.f32 %v189_v6, %v116_v21  ;;  %v133_v26 = vadd.f32 %v189_v6, %v132_v22 }
  0xe2   :  { %179 = vst.msk [vmem:[%s320_s3 + $0x8] sm:$0xf] %vm176_vm1, %v210_v17  ;;  %183 = vst.msk [vmem:[%s320_s3 + $0x18] sm:$0xf] %vm176_vm1, %v214_v18  ;;  %v211_v27 = vpack.c.bf16 %v125_v19, %v125_v19  ;;  %v215_v28 = vpack.c.bf16 %v141_v20, %v141_v20 }
  0xe3   :  { %177 = vst.msk [vmem:[%s320_s3] sm:$0xf] %vm176_vm1, %v208_v23  ;;  %181 = vst.msk [vmem:[%s320_s3 + $0x10] sm:$0xf] %vm176_vm1, %v212_v24  ;;  %v209_v29 = vpack.c.bf16 %v117_v25, %v117_v25  ;;  %v213_v30 = vpack.c.bf16 %v133_v26, %v133_v26 }
  0xe4   :  { %180 = vst.msk [vmem:[%s320_s3 + $0xc] sm:$0xf] %vm176_vm1, %v211_v27  ;;  %184 = vst.msk [vmem:[%s320_s3 + $0x1c] sm:$0xf] %vm176_vm1, %v215_v28 }
  0xe5   :  { %178 = vst.msk [vmem:[%s320_s3 + $0x4] sm:$0xf] %vm176_vm1, %v209_v29  ;;  %182 = vst.msk [vmem:[%s320_s3 + $0x14] sm:$0xf] %vm176_vm1, %v213_v30 }

// kernel: _lambda_.15
= control target key start
LH: loop header
LB: loop body
LE: loop exit
PB: predicated region body
PF: predicated region fallthrough
CT: control target
= control target key end

     0   :  { %vm66_vm0 = vcmask 261120   ;;  %vm248_vm1 = vcmask 519168   ;;  %s461_s1 = inlined_call_operand.vmem [shape: bf16[32,64], index: 1, kind: input, shape index: {}]   ;;  %s462_s0 = inlined_call_operand.vmem [shape: bf16[64,32], index: 0, kind: input, shape index: {}]   ;;  %s463_s2 = inlined_call_operand.vmem [shape: f32[1,64], index: 2, kind: input, shape index: {}]   ;;  %s464_s3 = inlined_call_operand.vmem [shape: bf16[64,64], index: 3, kind: output, shape index: {}]  }
   0x1   :  { %v310_v0 = vld [vmem:[%s461_s1] sm:$0xff]   ;;  %v311_v1 = vld [vmem:[%s461_s1 + $0x8] sm:$0xff]   ;;  %v313_v3 = vld [vmem:[%s462_s0 + $0x10] sm:$0xff]  }
   0x2   :  { %294 = vmatprep.subr.bf16.mxu0 %v310_v0  ;;  %306 = vmatprep.subr.bf16.mxu1 %v310_v0  ;;  %v312_v2 = vld [vmem:[%s462_s0] sm:$0xff]   ;;  %v314_v4 = vld [vmem:[%s462_s0 + $0x8] sm:$0xff]   ;;  %v315_v5 = vld [vmem:[%s462_s0 + $0x18] sm:$0xff]  }
   0x3   :  { %295 = vmatpush3.bf16.msra.mxu0 %v310_v0  ;;  %308 = vmatpush3.bf16.msra.mxu1 %v310_v0  ;;  %v261_v6 = vld [vmem:[%s463_s2] ss:$0 sm:$0xff] }
   0x4   :  { %296 = vmatprep.subr.bf16.mxu0 %v311_v1  ;;  %307 = vmatprep.subr.bf16.mxu1 %v311_v1 }
   0x5   :  { %298 = vmatprep.mubr.msk.bf16.mxu0 %vm66_vm0, %v312_v2  ;;  %302 = vmatprep.mubr.msk.bf16.mxu1 %vm66_vm0, %v313_v3 }
   0x7   :  { %297 = vmatpush3.bf16.msra.mxu0 %v311_v1  ;;  %309 = vmatpush3.bf16.msra.mxu1 %v311_v1 }
   0xa   :  { %299 = vmatmul.mubr.msk.bf16.vlgmr.msra.gmra.mrb[0].mxu0 %vm66_vm0, %v314_v4  ;;  %303 = vmatmul.mubr.msk.bf16.vlgmr.msra.gmra.mrb[0].mxu1 %vm66_vm0, %v315_v5 }
  0xdd   :  { %v300_v7 = vpop.f32.mrb[0].mxu0  ;;  %v304_v8 = vpop.f32.mrb[0].mxu1 }
  0xde   :  { %v373_v9 = vadd.f32 %v300_v7, %v261_v6  ;;  %v375_v10 = vadd.f32 %v304_v8, %v261_v6  ;;  %v113_v11 = vpop.f32.mrb[1].mxu0  ;;  %v129_v12 = vpop.f32.mrb[1].mxu1 }
  0xdf   :  { %v377_v13 = vadd.f32 %v261_v6, %v113_v11  ;;  %v379_v14 = vadd.f32 %v261_v6, %v129_v12  ;;  %v301_v15 = vpop.f32.mrb[2].mxu0  ;;  %v305_v16 = vpop.f32.mrb[2].mxu1 }
  0xe0   :  { %v154_v17 = vmul.f32 0.044715, %v373_v9  ;;  %v158_v18 = vmul.f32 0.044715, %v375_v10  ;;  %v387_v23 = vadd.f32 %v301_v15, %v261_v6  ;;  %v389_v24 = vadd.f32 %v305_v16, %v261_v6  ;;  %v116_v25 = vpop.f32.mrb[3].mxu0  ;;  %v132_v26 = vpop.f32.mrb[3].mxu1 }
  0xe1   :  { %v152_v19 = vmul.f32 0.044715, %v377_v13  ;;  %v156_v20 = vmul.f32 0.044715, %v379_v14  ;;  %v393_v29 = vadd.f32 %v261_v6, %v116_v25  ;;  %v404_v39 = vadd.f32 %v261_v6, %v132_v26 }
  0xe2   :  { %v162_v21 = vmul.f32 %v154_v17, %v373_v9  ;;  %v166_v22 = vmul.f32 %v158_v18, %v375_v10  ;;  %v155_v32 = vmul.f32 0.044715, %v387_v23  ;;  %v159_v35 = vmul.f32 0.044715, %v389_v24 }
  0xe3   :  { %v160_v27 = vmul.f32 %v152_v19, %v377_v13  ;;  %v164_v28 = vmul.f32 %v156_v20, %v379_v14  ;;  %v153_v43 = vmul.f32 0.044715, %v393_v29  ;;  %v157_v52 = vmul.f32 0.044715, %v404_v39 }
  0xe4   :  { %v170_v30 = vmul.f32 %v162_v21, %v373_v9  ;;  %v174_v31 = vmul.f32 %v166_v22, %v375_v10  ;;  %v163_v38 = vmul.f32 %v155_v32, %v387_v23  ;;  %v167_v42 = vmul.f32 %v159_v35, %v389_v24 }
  0xe5   :  { %v168_v33 = vmul.f32 %v160_v27, %v377_v13  ;;  %v172_v34 = vmul.f32 %v164_v28, %v379_v14  ;;  %v161_v50 = vmul.f32 %v153_v43, %v393_v29  ;;  %v165_v56 = vmul.f32 %v157_v52, %v404_v39 }
  0xe6   :  { %v178_v36 = vadd.f32 %v170_v30, %v373_v9  ;;  %v182_v37 = vadd.f32 %v174_v31, %v375_v10  ;;  %v171_v46 = vmul.f32 %v163_v38, %v387_v23  ;;  %v175_v49 = vmul.f32 %v167_v42, %v389_v24 }
  0xe7   :  { %v176_v40 = vadd.f32 %v168_v33, %v377_v13  ;;  %v180_v41 = vadd.f32 %v172_v34, %v379_v14  ;;  %v169_v54 = vmul.f32 %v161_v50, %v393_v29  ;;  %v173_v59 = vmul.f32 %v165_v56, %v404_v39 }
  0xe8   :  { %v186_v44 = vmul.f32 0.7978846, %v178_v36  ;;  %v190_v45 = vmul.f32 0.7978846, %v182_v37  ;;  %v179_v51 = vadd.f32 %v171_v46, %v387_v23  ;;  %v183_v53 = vadd.f32 %v175_v49, %v389_v24 }
  0xe9   :  { %v184_v47 = vmul.f32 0.7978846, %v176_v40  ;;  %v188_v48 = vmul.f32 0.7978846, %v180_v41  ;;  %v177_v58 = vadd.f32 %v169_v54, %v393_v29  ;;  %v181_v61 = vadd.f32 %v173_v59, %v404_v39 }
  0xea   :  { %316 = vtanh.f32 %v186_v44  ;;  %v187_v55 = vmul.f32 0.7978846, %v179_v51  ;;  %v191_v57 = vmul.f32 0.7978846, %v183_v53  ;;  %v146_v1 = vmul.f32 0.5, %v373_v9 }
  0xeb   :  { %318 = vtanh.f32 %v190_v45  ;;  %v185_v60 = vmul.f32 0.7978846, %v177_v58  ;;  %v189_v62 = vmul.f32 0.7978846, %v181_v61  ;;  %v150_v4 = vmul.f32 0.5, %v375_v10 }
  0xec   :  { %320 = vtanh.f32 %v184_v47  ;;  %v144_v8 = vmul.f32 0.5, %v377_v13  ;;  %v148_v16 = vmul.f32 0.5, %v379_v14  ;;  %v147_v9 = vmul.f32 0.5, %v387_v23 }
  0xed   :  { %322 = vtanh.f32 %v188_v48  ;;  %v151_v25 = vmul.f32 0.5, %v389_v24  ;;  %v145_v30 = vmul.f32 0.5, %v393_v29  ;;  %v149_v29 = vmul.f32 0.5, %v404_v39 }
  0xee   :  { %324 = vtanh.f32 %v187_v55 }
  0xef   :  { %326 = vtanh.f32 %v191_v57 }
  0xf0   :  { %328 = vtanh.f32 %v185_v60 }
  0xf1   :  { %330 = vtanh.f32 %v189_v62 }
  0xf4   :  { %v317_v63 = vpop.eup %316 }
  0xf5   :  { %v319_v0 = vpop.eup %318  ;;  %v202_v2 = vadd.f32 1.0, %v317_v63 }
  0xf6   :  { %v321_v3 = vpop.eup %320  ;;  %v206_v5 = vadd.f32 1.0, %v319_v0 }
  0xf7   :  { %v323_v6 = vpop.eup %322  ;;  %v210_v7 = vmul.f32 %v202_v2, %v146_v1  ;;  %v200_v11 = vadd.f32 1.0, %v321_v3 }
  0xf8   :  { %v325_v12 = vpop.eup %324  ;;  %v214_v15 = vmul.f32 %v206_v5, %v150_v4  ;;  %v204_v17 = vadd.f32 1.0, %v323_v6 }
  0xf9   :  { %v327_v18 = vpop.eup %326  ;;  %v282_v19 = vpack.c.bf16 %v210_v7, %v210_v7  ;;  %v208_v20 = vmul.f32 %v200_v11, %v144_v8  ;;  %v203_v21 = vadd.f32 1.0, %v325_v12 }
  0xfa   :  { %v286_v22 = vpack.c.bf16 %v214_v15, %v214_v15  ;;  %v212_v10 = vmul.f32 %v204_v17, %v148_v16  ;;  %v207_v26 = vadd.f32 1.0, %v327_v18  ;;  %v329_v27 = vpop.eup %328 }
  0xfb   :  { %251 = vst.msk [vmem:[%s464_s3 + $0x8] sm:$0xf] %vm248_vm1, %v282_v19  ;;  %v280_v13 = vpack.c.bf16 %v208_v20, %v208_v20  ;;  %v211_v14 = vmul.f32 %v203_v21, %v147_v9  ;;  %v201_v31 = vadd.f32 1.0, %v329_v27  ;;  %v331_v32 = vpop.eup %330 }
  0xfc   :  { %255 = vst.msk [vmem:[%s464_s3 + $0x18] sm:$0xf] %vm248_vm1, %v286_v22  ;;  %v284_v23 = vpack.c.bf16 %v212_v10, %v212_v10  ;;  %v215_v28 = vmul.f32 %v207_v26, %v151_v25  ;;  %v205_v35 = vadd.f32 1.0, %v331_v32 }
  0xfd   :  { %249 = vst.msk [vmem:[%s464_s3] sm:$0xf] %vm248_vm1, %v280_v13  ;;  %v283_v24 = vpack.c.bf16 %v211_v14, %v211_v14  ;;  %v209_v34 = vmul.f32 %v201_v31, %v145_v30 }
  0xfe   :  { %253 = vst.msk [vmem:[%s464_s3 + $0x10] sm:$0xf] %vm248_vm1, %v284_v23  ;;  %v287_v33 = vpack.c.bf16 %v215_v28, %v215_v28  ;;  %v213_v37 = vmul.f32 %v205_v35, %v149_v29 }
  0xff   :  { %252 = vst.msk [vmem:[%s464_s3 + $0xc] sm:$0xf] %vm248_vm1, %v283_v24  ;;  %v281_v36 = vpack.c.bf16 %v209_v34, %v209_v34 }
 0x100   :  { %256 = vst.msk [vmem:[%s464_s3 + $0x1c] sm:$0xf] %vm248_vm1, %v287_v33  ;;  %v285_v38 = vpack.c.bf16 %v213_v37, %v213_v37 }
 0x101   :  { %250 = vst.msk [vmem:[%s464_s3 + $0x4] sm:$0xf] %vm248_vm1, %v281_v36 }
 0x102   :  { %254 = vst.msk [vmem:[%s464_s3 + $0x14] sm:$0xf] %vm248_vm1, %v285_v38 }

// kernel: _lambda_.14
= control target key start
LH: loop header
LB: loop body
LE: loop exit
PB: predicated region body
PF: predicated region fallthrough
CT: control target
= control target key end

     0   :  { %vm75_vm0 = vcmask 261120   ;;  %vm344_vm1 = vcmask 257024   ;;  %s615_s1 = inlined_call_operand.vmem [shape: bf16[32,32], index: 1, kind: input, shape index: {}]   ;;  %s616_s0 = inlined_call_operand.vmem [shape: bf16[64,32], index: 0, kind: input, shape index: {}]   ;;  %s617_s3 = inlined_call_operand.vmem [shape: bf16[64,32], index: 3, kind: input, shape index: {}]   ;;  %s618_s2 = inlined_call_operand.vmem [shape: f32[1,32], index: 2, kind: input, shape index: {}]   ;;  %s619_s4 = inlined_call_operand.vmem [shape: f32[1,32], index: 4, kind: input, shape index: {}]   ;;  %s620_s5 = inlined_call_operand.vmem [shape: f32[1,32], index: 5, kind: input, shape index: {}]   ;;  %s621_s6 = inlined_call_operand.vmem [shape: bf16[64,32], index: 6, kind: output, shape index: {}]  }
   0x1   :  { %v427_v0 = vld [vmem:[%s615_s1] sm:$0xff]   ;;  %v428_v1 = vld [vmem:[%s615_s1 + $0x8] sm:$0xff]   ;;  %v431_v3 = vld [vmem:[%s616_s0 + $0x10] sm:$0xff]  }
   0x2   :  { %411 = vmatprep.subr.bf16.mxu0 %v427_v0  ;;  %423 = vmatprep.subr.bf16.mxu1 %v427_v0  ;;  %v429_v2 = vld [vmem:[%s616_s0] sm:$0xff]   ;;  %v430_v4 = vld [vmem:[%s616_s0 + $0x8] sm:$0xff]   ;;  %v432_v5 = vld [vmem:[%s616_s0 + $0x18] sm:$0xff]  }
   0x3   :  { %412 = vmatpush3.bf16.msra.mxu0 %v427_v0  ;;  %425 = vmatpush3.bf16.msra.mxu1 %v427_v0  ;;  %v402_v6 = vld [vmem:[%s617_s3 + $0x8] sm:$0xff]   ;;  %v387_v7 = vld [vmem:[%s617_s3] sm:$0xff]   ;;  %v403_v8 = vld [vmem:[%s617_s3 + $0x10] sm:$0xff]  }
   0x4   :  { %413 = vmatprep.subr.bf16.mxu0 %v428_v1  ;;  %424 = vmatprep.subr.bf16.mxu1 %v428_v1  ;;  %v357_v9 = vld [vmem:[%s618_s2] ss:$0 sm:$0xff]  ;;  %v392_v10 = vunpack.c.l.bf16 %v402_v6  ;;  %v388_v13 = vunpack.c.l.bf16 %v387_v7  ;;  %v396_v14 = vunpack.c.l.bf16 %v403_v8  ;;  %v393_v18 = vunpack.c.h.bf16 %v402_v6  ;;  %v404_v36 = vld [vmem:[%s617_s3 + $0x18] sm:$0xff]  }
   0x5   :  { %415 = vmatprep.mubr.msk.bf16.mxu0 %vm75_vm0, %v429_v2  ;;  %419 = vmatprep.mubr.msk.bf16.mxu1 %vm75_vm0, %v431_v3  ;;  %v397_v32 = vunpack.c.h.bf16 %v403_v8  ;;  %v389_v35 = vunpack.c.h.bf16 %v387_v7  ;;  %v401_v41 = vunpack.c.h.bf16 %v404_v36  ;;  %v400_v44 = vunpack.c.l.bf16 %v404_v36 }
   0x7   :  { %414 = vmatpush3.bf16.msra.mxu0 %v428_v1  ;;  %426 = vmatpush3.bf16.msra.mxu1 %v428_v1 }
   0xa   :  { %416 = vmatmul.mubr.msk.bf16.vlgmr.msra.gmra.mrb[0].mxu0 %vm75_vm0, %v430_v4  ;;  %420 = vmatmul.mubr.msk.bf16.vlgmr.msra.gmra.mrb[0].mxu1 %vm75_vm0, %v432_v5 }
  0xdd   :  { %v417_v11 = vpop.f32.mrb[0].mxu0  ;;  %v421_v12 = vpop.f32.mrb[0].mxu1 }
  0xde   :  { %v131_v15 = vadd.f32 %v417_v11, %v357_v9  ;;  %v122_v16 = vpop.f32.mrb[1].mxu0  ;;  %v138_v17 = vpop.f32.mrb[1].mxu1  ;;  %v147_v42 = vadd.f32 %v421_v12, %v357_v9 }
  0xdf   :  { %v123_v19 = vadd.f32 %v357_v9, %v122_v16  ;;  %v418_v20 = vpop.f32.mrb[2].mxu0  ;;  %v139_v21 = vadd.f32 %v357_v9, %v138_v17  ;;  %v422_v22 = vpop.f32.mrb[2].mxu1 }
  0xe0   :  { %v134_v23 = vadd.f32 %v418_v20, %v357_v9  ;;  %v125_v24 = vpop.f32.mrb[3].mxu0  ;;  %v141_v25 = vpop.f32.mrb[3].mxu1  ;;  %v171_v26 = vadd.f32 %v392_v10, %v131_v15  ;;  %v150_v38 = vadd.f32 %v422_v22, %v357_v9  ;;  %v175_v48 = vadd.f32 %v400_v44, %v147_v42 }
  0xe1   :  { %v169_v27 = vadd.f32 %v388_v13, %v123_v19  ;;  %v173_v28 = vadd.f32 %v396_v14, %v139_v21  ;;  %v142_v29 = vadd.f32 %v357_v9, %v141_v25  ;;  %v126_v33 = vadd.f32 %v357_v9, %v125_v24 }
  0xe2   :  { %v183_v30 = vsel %vm75_vm0, %v171_v26, 0.0  ;;  %v172_v31 = vadd.f32 %v393_v18, %v134_v23  ;;  %v176_v46 = vadd.f32 %v401_v41, %v150_v38  ;;  %v195_v50 = vsel %vm75_vm0, %v175_v48, 0.0 }
  0xe3   :  { %184 = vadd.xlane.f32.xlu1 %v183_v30  ;;  %v177_v34 = vsel %vm75_vm0, %v169_v27, 0.0  ;;  %v189_v37 = vsel %vm75_vm0, %v173_v28, 0.0  ;;  %v174_v40 = vadd.f32 %v397_v32, %v142_v29  ;;  %v170_v43 = vadd.f32 %v389_v35, %v126_v33 }
  0xe4   :  { %178 = vadd.xlane.f32.xlu0 %v177_v34  ;;  %v186_v39 = vsel %vm75_vm0, %v172_v31, 0.0  ;;  %v198_v49 = vsel %vm75_vm0, %v176_v46, 0.0 }
  0xe5   :  { %v192_v45 = vsel %vm75_vm0, %v174_v40, 0.0  ;;  %v180_v47 = vsel %vm75_vm0, %v170_v43, 0.0 }
  0xe7   :  { %187 = vadd.xlane.f32.xlu1 %v186_v39 }
  0xe8   :  { %190 = vadd.xlane.f32.xlu0 %v189_v37 }
  0xeb   :  { %193 = vadd.xlane.f32.xlu1 %v192_v45 }
  0xec   :  { %181 = vadd.xlane.f32.xlu0 %v180_v47  ;;  %v368_v47 = vld [vmem:[%s619_s4] ss:$0 sm:$0xff] }
  0xef   :  { %199 = vadd.xlane.f32.xlu1 %v198_v49 }
  0xf0   :  { %196 = vadd.xlane.f32.xlu0 %v195_v50 }
 0x170   :  { %v185_v51 = vpop.xlane.xlu1 %184 }
 0x171   :  { %v204_v52 = vmul.f32 0.03125, %v185_v51  ;;  %v179_v53 = vpop.xlane.xlu0 %178  ;;  %v369_v51 = vld [vmem:[%s620_s5] ss:$0 sm:$0xff] }
 0x172   :  { %v202_v54 = vmul.f32 0.03125, %v179_v53 }
 0x173   :  { %v529_v55 = vsub.f32 %v171_v26, %v204_v52 }
 0x174   :  { %v531_v56 = vsub.f32 %v169_v27, %v202_v54  ;;  %v188_v57 = vpop.xlane.xlu1 %187 }
 0x175   :  { %v205_v58 = vmul.f32 0.03125, %v188_v57  ;;  %v191_v59 = vpop.xlane.xlu0 %190  ;;  %v220_v60 = vmul.f32 %v529_v55, %v529_v55 }
 0x176   :  { %v206_v61 = vmul.f32 0.03125, %v191_v59  ;;  %v218_v0 = vmul.f32 %v531_v56, %v531_v56 }
 0x177   :  { %v535_v62 = vsub.f32 %v172_v31, %v205_v58  ;;  %v232_v63 = vsel %vm75_vm0, %v220_v60, 0.0 }
 0x178   :  { %v540_v1 = vsub.f32 %v173_v28, %v206_v61  ;;  %v194_v2 = vpop.xlane.xlu1 %193  ;;  %233 = vadd.xlane.f32.xlu0 %v232_v63  ;;  %v226_v8 = vsel %vm75_vm0, %v218_v0, 0.0 }
 0x179   :  { %v207_v3 = vmul.f32 0.03125, %v194_v2  ;;  %v182_v4 = vpop.xlane.xlu0 %181  ;;  %v221_v5 = vmul.f32 %v535_v62, %v535_v62 }
 0x17a   :  { %v203_v6 = vmul.f32 0.03125, %v182_v4  ;;  %v222_v9 = vmul.f32 %v540_v1, %v540_v1 }
 0x17b   :  { %v235_v7 = vsel %vm75_vm0, %v221_v5, 0.0  ;;  %v548_v10 = vsub.f32 %v174_v40, %v207_v3 }
 0x17c   :  { %v550_v11 = vsub.f32 %v170_v43, %v203_v6  ;;  %236 = vadd.xlane.f32.xlu1 %v235_v7  ;;  %v200_v12 = vpop.xlane.xlu1 %199  ;;  %227 = vadd.xlane.f32.xlu0 %v226_v8  ;;  %v238_v17 = vsel %vm75_vm0, %v222_v9, 0.0 }
 0x17d   :  { %v209_v13 = vmul.f32 0.03125, %v200_v12  ;;  %v197_v14 = vpop.xlane.xlu0 %196  ;;  %v223_v21 = vmul.f32 %v548_v10, %v548_v10 }
 0x17e   :  { %v208_v15 = vmul.f32 0.03125, %v197_v14  ;;  %v219_v16 = vmul.f32 %v550_v11, %v550_v11 }
 0x17f   :  { %v555_v18 = vsub.f32 %v176_v46, %v209_v13  ;;  %v241_v23 = vsel %vm75_vm0, %v223_v21, 0.0 }
 0x180   :  { %v557_v19 = vsub.f32 %v175_v48, %v208_v15  ;;  %239 = vadd.xlane.f32.xlu0 %v238_v17  ;;  %v229_v20 = vsel %vm75_vm0, %v219_v16, 0.0 }
 0x181   :  { %230 = vadd.xlane.f32.xlu1 %v229_v20  ;;  %v225_v25 = vmul.f32 %v555_v18, %v555_v18 }
 0x182   :  { %v224_v22 = vmul.f32 %v557_v19, %v557_v19 }
 0x183   :  { %v247_v26 = vsel %vm75_vm0, %v225_v25, 0.0 }
 0x184   :  { %v244_v24 = vsel %vm75_vm0, %v224_v22, 0.0 }
 0x185   :  { %242 = vadd.xlane.f32.xlu1 %v241_v23  ;;  %245 = vadd.xlane.f32.xlu0 %v244_v24 }
 0x189   :  { %248 = vadd.xlane.f32.xlu1 %v247_v26 }
 0x205   :  { %v234_v27 = vpop.xlane.xlu0 %233 }
 0x206   :  { %v252_v28 = vmul.f32 0.03125, %v234_v27 }
 0x208   :  { %v260_v29 = vadd.f32 1e-12, %v252_v28 }
 0x209   :  { %v237_v30 = vpop.xlane.xlu1 %236  ;;  %v228_v31 = vpop.xlane.xlu0 %227 }
 0x20a   :  { %433 = vrsqrt.f32 %v260_v29  ;;  %v253_v32 = vmul.f32 0.03125, %v237_v30  ;;  %v250_v33 = vmul.f32 0.03125, %v228_v31 }
 0x20c   :  { %v261_v34 = vadd.f32 1e-12, %v253_v32  ;;  %v258_v35 = vadd.f32 1e-12, %v250_v33 }
 0x20d   :  { %v240_v36 = vpop.xlane.xlu0 %239 }
 0x20e   :  { %435 = vrsqrt.f32 %v261_v34  ;;  %v254_v37 = vmul.f32 0.03125, %v240_v36  ;;  %v231_v38 = vpop.xlane.xlu1 %230 }
 0x20f   :  { %437 = vrsqrt.f32 %v258_v35  ;;  %v251_v39 = vmul.f32 0.03125, %v231_v38 }
 0x210   :  { %v262_v40 = vadd.f32 1e-12, %v254_v37 }
 0x211   :  { %v259_v41 = vadd.f32 1e-12, %v251_v39 }
 0x212   :  { %439 = vrsqrt.f32 %v262_v40  ;;  %v243_v42 = vpop.xlane.xlu1 %242  ;;  %v246_v43 = vpop.xlane.xlu0 %245 }
 0x213   :  { %441 = vrsqrt.f32 %v259_v41  ;;  %v255_v44 = vmul.f32 0.03125, %v243_v42  ;;  %v256_v45 = vmul.f32 0.03125, %v246_v43 }
 0x214   :  { %v434_v46 = vpop.eup %433 }
 0x215   :  { %v276_v48 = vmul.f32 %v434_v46, %v529_v55  ;;  %v263_v49 = vadd.f32 1e-12, %v255_v44  ;;  %v264_v50 = vadd.f32 1e-12, %v256_v45 }
 0x216   :  { %v249_v52 = vpop.xlane.xlu1 %248 }
 0x217   :  { %v291_v53 = vmul.f32 %v368_v47, %v276_v48  ;;  %443 = vrsqrt.f32 %v263_v49  ;;  %v257_v54 = vmul.f32 0.03125, %v249_v52 }
 0x218   :  { %v436_v57 = vpop.eup %435  ;;  %445 = vrsqrt.f32 %v264_v50 }
 0x219   :  { %v438_v58 = vpop.eup %437  ;;  %v306_v59 = vadd.f32 %v369_v51, %v291_v53  ;;  %v277_v60 = vmul.f32 %v436_v57, %v535_v62  ;;  %v265_v61 = vadd.f32 1e-12, %v257_v54 }
 0x21a   :  { %v274_v55 = vmul.f32 %v438_v58, %v531_v56 }
 0x21b   :  { %v380_v63 = vpack.c.bf16 %v306_v59, %v306_v59  ;;  %v292_v0 = vmul.f32 %v368_v47, %v277_v60  ;;  %447 = vrsqrt.f32 %v265_v61 }
 0x21c   :  { %v440_v2 = vpop.eup %439  ;;  %v289_v3 = vmul.f32 %v368_v47, %v274_v55 }
 0x21d   :  { %v442_v4 = vpop.eup %441  ;;  %347 = vst.msk [vmem:[%s621_s6 + $0x8] sm:$0xf] %vm344_vm1, %v380_v63  ;;  %v307_v5 = vadd.f32 %v369_v51, %v292_v0  ;;  %v278_v6 = vmul.f32 %v440_v2, %v540_v1 }
 0x21e   :  { %v304_v7 = vadd.f32 %v369_v51, %v289_v3  ;;  %v275_v62 = vmul.f32 %v442_v4, %v550_v11 }
 0x21f   :  { %v381_v8 = vpack.c.bf16 %v307_v5, %v307_v5  ;;  %v293_v9 = vmul.f32 %v368_v47, %v278_v6 }
 0x220   :  { %v378_v56 = vpack.c.bf16 %v304_v7, %v304_v7  ;;  %v290_v12 = vmul.f32 %v368_v47, %v275_v62 }
 0x221   :  { %v444_v13 = vpop.eup %443  ;;  %348 = vst.msk [vmem:[%s621_s6 + $0xc] sm:$0xf] %vm344_vm1, %v381_v8  ;;  %v308_v14 = vadd.f32 %v369_v51, %v293_v9 }
 0x222   :  { %v446_v15 = vpop.eup %445  ;;  %345 = vst.msk [vmem:[%s621_s6] sm:$0xf] %vm344_vm1, %v378_v56  ;;  %v305_v1 = vadd.f32 %v369_v51, %v290_v12  ;;  %v279_v11 = vmul.f32 %v444_v13, %v548_v10 }
 0x223   :  { %v382_v16 = vpack.c.bf16 %v308_v14, %v308_v14  ;;  %v280_v17 = vmul.f32 %v446_v15, %v557_v19 }
 0x224   :  { %v379_v20 = vpack.c.bf16 %v305_v1, %v305_v1  ;;  %v294_v21 = vmul.f32 %v368_v47, %v279_v11 }
 0x225   :  { %v448_v22 = vpop.eup %447  ;;  %349 = vst.msk [vmem:[%s621_s6 + $0x10] sm:$0xf] %vm344_vm1, %v382_v16  ;;  %v295_v23 = vmul.f32 %v368_v47, %v280_v17 }
 0x226   :  { %346 = vst.msk [vmem:[%s621_s6 + $0x4] sm:$0xf] %vm344_vm1, %v379_v20  ;;  %v309_v24 = vadd.f32 %v369_v51, %v294_v21  ;;  %v281_v10 = vmul.f32 %v448_v22, %v555_v18 }
 0x227   :  { %v310_v25 = vadd.f32 %v369_v51, %v295_v23 }
 0x228   :  { %v383_v26 = vpack.c.bf16 %v309_v24, %v309_v24  ;;  %v296_v19 = vmul.f32 %v368_v47, %v281_v10 }
 0x229   :  { %v384_v27 = vpack.c.bf16 %v310_v25, %v310_v25 }
 0x22a   :  { %350 = vst.msk [vmem:[%s621_s6 + $0x14] sm:$0xf] %vm344_vm1, %v383_v26  ;;  %v311_v28 = vadd.f32 %v369_v51, %v296_v19 }
 0x22b   :  { %351 = vst.msk [vmem:[%s621_s6 + $0x18] sm:$0xf] %vm344_vm1, %v384_v27 }
 0x22c   :  { %v385_v29 = vpack.c.bf16 %v311_v28, %v311_v28 }
 0x22e   :  { %352 = vst.msk [vmem:[%s621_s6 + $0x1c] sm:$0xf] %vm344_vm1, %v385_v29 }

// kernel: _lambda_.23
= control target key start
LH: loop header
LB: loop body
LE: loop exit
PB: predicated region body
PF: predicated region fallthrough
CT: control target
= control target key end

     0   :  { %vm15_vm0 = vcmask 261120   ;;  %v136_v1 = vmov 0.0   ;;  %vm137_vm1 = vmmov 0   ;;  %s175_s0 = inlined_call_operand.vmem [shape: bf16[8,32], index: 0, kind: input, shape index: {}, may-alias: {0,1}]   ;;  %s176_s1 = inlined_call_operand.vmem [shape: bf16[8,32], index: 1, kind: input, shape index: {}, may-alias: {0,1}]   ;;  %s177_s2 = inlined_call_operand.hbm [shape: f32[8,8], index: 2, kind: output, shape index: {}]  }
   0x1   :  { %v14_v0 = vld [vmem:[%s176_s1] sm:$0xf]  ;;  %99 = vmatprep.subr.bf16.mxu0 %v136_v1  ;;  %101 = vmatprep.mubr.msk.bf16.mxu0 %vm137_vm1, %v136_v1 }
   0x2   :  { %v20_v2 = vsel %vm15_vm0, %v14_v0, 0 }
   0x3   :  { %7 = vsyncpa [#allocation3], 0  ;;  %100 = vmatpush3.bf16.xpose.msra.mxu0 %v20_v2  ;;  %v13_v3 = vld [vmem:[%s175_s0] sm:$0xf]  ;;  %v62_v4 = vlaneseq  ;;  %vm68_vm3 = vcmask 64512   ;;  %s138_s0 = smov [#allocation2]  }
   0x4   :  { %s88_s1 = sshll.u32 %s138_s0, 4  ;;  %s89_s1 = int_to_ptr.vmem [resolvable:$true] %s88_s1 }
   0x5   :  { %v63_v5 = vshrl.u32 %v62_v4, 7  ;;  %v65_v6 = vand.u32 127, %v62_v4  ;;  %s112_s13 = scalar_lea.vmem %s89_s1, 128  ;;  %p117_p1 = scmp.lt.s32.totalorder %s89_s1, %s89_s1 }
   0x6   :  { %p113_p0 = scmp.ne.s32.totalorder %s89_s1, %s112_s13  ;;  %p118_p2 = scmp.lt.s32.totalorder %s112_s13, %s112_s13 }
   0x7   :  { %vm66_vm2 = vcmp.eq.s32.totalorder %v63_v5, %v65_v6 }
   0x8   :  { %p119_p3 = por %p118_p2, %p117_p1 }
   0xa   :  { %102 = vmatmul.mubr.msk.bf16.vlgmr.msra.gmra.mrb[0].mxu0 %vm15_vm0, %v13_v3  ;;  %p120_p4 = pnand %p119_p3, %p113_p0 }
  0xdd   :  { %v56_v7 = vpop.f32.mrb[0].mxu0 }
  0xde   :  { %v67_v8 = vsel %vm66_vm2, 0.0, %v56_v7  ;;  %v103_v9 = vpop.f32.mrb[1].mxu0 }
  0xdf   :  { %v59_v10 = vpop.f32.mrb[2].mxu0  ;;  %v69_v11 = vsel %vm68_vm3, %v67_v8, -inf }
  0xe0   :  { %70 = vmax.xlane.f32.xlu0 %v69_v11  ;;  %v104_v12 = vpop.f32.mrb[3].mxu0 }
 0x16d   :  { %v71_v13 = vpop.xlane.xlu0 %70 }
 0x16e   :  { %v72_v14 = vsub.f32 %v67_v8, %v71_v13 }
 0x170   :  { %v73_v15 = vmul.f32 1.442695, %v72_v14 }
 0x172   :  { %108 = vpow2.f32 %v73_v15 }
 0x17c   :  { %v109_v16 = vpop.eup %108 }
 0x17d   :  { %v75_v17 = vsel %vm68_vm3, %v109_v16, 0.0 }
 0x17e   :  { %76 = vadd.xlane.f32.xlu0 %v75_v17 }
 0x20b   :  { %v77_v18 = vpop.xlane.xlu0 %76 }
 0x20c   :  { %110 = vlog2.f32 %v77_v18 }
 0x216   :  { %v111_v19 = vpop.eup %110 }
 0x217   :  { %v79_v20 = vmul.f32 0.6931472, %v111_v19 }
 0x219   :  { %v80_v21 = vsub.f32 %v72_v14, %v79_v20 }
 0x21b   :  { %81 = vst.msk [vmem:[#allocation2] sm:$0xff] %vm68_vm3, %v80_v21 }
 0x21c   :  { %123 = shalt.err (!%p120_p4)
}
 0x21d   :  { %s124_s16 = scalar_lea.hbm %s177_s2, 128 }
 0x21e   :  { %p125_p5 = scmp.ne.s32.totalorder %s177_s2, %s124_s16  ;;  %p128_p6 = scmp.lt.u32.totalorder %s124_s16, %s177_s2 }
 0x220   :  { %p130_p7 = pnand %p128_p6, %p125_p5 }
 0x222   :  { %133 = shalt.err (!%p130_p7)
}
 0x223   :  { %91 = dma.vmem_to_hbm [thread:$0]  %s89_s1, 128, %s177_s2, [#allocation3]  }
 0x224   :  { %134 = dma.done.wait [#allocation3], 128  }
 0x225   :  { %135 = vsyncadd [#allocation3], 4294967168 }
 0x226   :  { %95 = vsyncpa [#allocation3], 1 }

// kernel: _lambda_.16
= control target key start
LH: loop header
LB: loop body
LE: loop exit
PB: predicated region body
PF: predicated region fallthrough
CT: control target
= control target key end

     0   :  { %vm91_vm0 = vcmask 523264   ;;  %vm193_vm1 = vcmask 261120   ;;  %vm361_vm2 = vcmask 257024   ;;  %s652_s1 = inlined_call_operand.vmem [shape: bf16[64,32], index: 1, kind: input, shape index: {}]   ;;  %s653_s0 = inlined_call_operand.vmem [shape: bf16[64,64], index: 0, kind: input, shape index: {}]   ;;  %s654_s3 = inlined_call_operand.vmem [shape: bf16[64,32], index: 3, kind: input, shape index: {}]   ;;  %s655_s2 = inlined_call_operand.vmem [shape: f32[1,32], index: 2, kind: input, shape index: {}]   ;;  %s656_s4 = inlined_call_operand.vmem [shape: f32[1,32], index: 4, kind: input, shape index: {}]   ;;  %s657_s5 = inlined_call_operand.vmem [shape: f32[1,32], index: 5, kind: input, shape index: {}]   ;;  %s658_s6 = inlined_call_operand.vmem [shape: bf16[64,32], index: 6, kind: output, shape index: {}]  }
   0x1   :  { %v456_v0 = vld [vmem:[%s652_s1] sm:$0xff]   ;;  %v457_v1 = vld [vmem:[%s652_s1 + $0x8] sm:$0xff]   ;;  %v458_v2 = vld [vmem:[%s652_s1 + $0x10] sm:$0xff]  }
   0x2   :  { %432 = vmatprep.subr.bf16.mxu0 %v456_v0  ;;  %448 = vmatprep.subr.bf16.mxu1 %v456_v0  ;;  %v460_v3 = vld [vmem:[%s653_s0] sm:$0xff]   ;;  %v462_v4 = vld [vmem:[%s653_s0 + $0x10] sm:$0xff]   ;;  %v459_v5 = vld [vmem:[%s652_s1 + $0x18] sm:$0xff]  }
   0x3   :  { %433 = vmatpush3.bf16.msra.mxu0 %v456_v0  ;;  %452 = vmatpush3.bf16.msra.mxu1 %v456_v0  ;;  %v461_v6 = vld [vmem:[%s653_s0 + $0x8] sm:$0xff]   ;;  %v463_v7 = vld [vmem:[%s653_s0 + $0x18] sm:$0xff]   ;;  %v406_v9 = vld [vmem:[%s654_s3] sm:$0xff]  }
   0x4   :  { %434 = vmatprep.subr.bf16.mxu0 %v457_v1  ;;  %449 = vmatprep.subr.bf16.mxu1 %v457_v1  ;;  %v421_v8 = vld [vmem:[%s654_s3 + $0x8] sm:$0xff]   ;;  %v422_v10 = vld [vmem:[%s654_s3 + $0x10] sm:$0xff]   ;;  %v374_v11 = vld [vmem:[%s655_s2] ss:$0 sm:$0xff]  ;;  %v407_v15 = vunpack.c.l.bf16 %v406_v9  ;;  %v408_v37 = vunpack.c.h.bf16 %v406_v9 }
   0x5   :  { %440 = vmatprep.mubr.msk.bf16.mxu0 %vm91_vm0, %v460_v3  ;;  %444 = vmatprep.mubr.msk.bf16.mxu1 %vm91_vm0, %v462_v4  ;;  %v411_v12 = vunpack.c.l.bf16 %v421_v8  ;;  %v415_v16 = vunpack.c.l.bf16 %v422_v10  ;;  %v412_v20 = vunpack.c.h.bf16 %v421_v8  ;;  %v416_v34 = vunpack.c.h.bf16 %v422_v10  ;;  %v423_v38 = vld [vmem:[%s654_s3 + $0x18] sm:$0xff]  }
   0x6   :  { %v420_v43 = vunpack.c.h.bf16 %v423_v38  ;;  %v419_v46 = vunpack.c.l.bf16 %v423_v38 }
   0x7   :  { %435 = vmatpush3.bf16.msra.mxu0 %v457_v1  ;;  %453 = vmatpush3.bf16.msra.mxu1 %v457_v1 }
   0x8   :  { %436 = vmatprep.subr.bf16.mxu0 %v458_v2  ;;  %450 = vmatprep.subr.bf16.mxu1 %v458_v2 }
   0xb   :  { %437 = vmatpush3.bf16.msra.mxu0 %v458_v2  ;;  %454 = vmatpush3.bf16.msra.mxu1 %v458_v2 }
   0xc   :  { %438 = vmatprep.subr.bf16.mxu0 %v459_v5  ;;  %451 = vmatprep.subr.bf16.mxu1 %v459_v5 }
   0xf   :  { %439 = vmatpush3.bf16.msra.mxu0 %v459_v5  ;;  %455 = vmatpush3.bf16.msra.mxu1 %v459_v5 }
  0x12   :  { %441 = vmatmul.mubr.msk.bf16.vlgmr.msra.gmra.mrb[0].mxu0 %vm91_vm0, %v461_v6  ;;  %445 = vmatmul.mubr.msk.bf16.vlgmr.msra.gmra.mrb[0].mxu1 %vm91_vm0, %v463_v7 }
  0xe5   :  { %v442_v13 = vpop.f32.mrb[0].mxu0  ;;  %v446_v14 = vpop.f32.mrb[0].mxu1 }
  0xe6   :  { %v147_v17 = vadd.f32 %v442_v13, %v374_v11  ;;  %v138_v18 = vpop.f32.mrb[1].mxu0  ;;  %v154_v19 = vpop.f32.mrb[1].mxu1  ;;  %v163_v44 = vadd.f32 %v446_v14, %v374_v11 }
  0xe7   :  { %v139_v21 = vadd.f32 %v374_v11, %v138_v18  ;;  %v443_v22 = vpop.f32.mrb[2].mxu0  ;;  %v155_v23 = vadd.f32 %v374_v11, %v154_v19  ;;  %v447_v24 = vpop.f32.mrb[2].mxu1 }
  0xe8   :  { %v150_v25 = vadd.f32 %v443_v22, %v374_v11  ;;  %v141_v26 = vpop.f32.mrb[3].mxu0  ;;  %v157_v27 = vpop.f32.mrb[3].mxu1  ;;  %v187_v28 = vadd.f32 %v411_v12, %v147_v17  ;;  %v166_v40 = vadd.f32 %v447_v24, %v374_v11  ;;  %v191_v50 = vadd.f32 %v419_v46, %v163_v44 }
  0xe9   :  { %v185_v29 = vadd.f32 %v407_v15, %v139_v21  ;;  %v189_v30 = vadd.f32 %v415_v16, %v155_v23  ;;  %v158_v31 = vadd.f32 %v374_v11, %v157_v27  ;;  %v142_v35 = vadd.f32 %v374_v11, %v141_v26 }
  0xea   :  { %v200_v32 = vsel %vm193_vm1, %v187_v28, 0.0  ;;  %v188_v33 = vadd.f32 %v412_v20, %v150_v25  ;;  %v192_v48 = vadd.f32 %v420_v43, %v166_v40  ;;  %v212_v52 = vsel %vm193_vm1, %v191_v50, 0.0 }
  0xeb   :  { %201 = vadd.xlane.f32.xlu1 %v200_v32  ;;  %v194_v36 = vsel %vm193_vm1, %v185_v29, 0.0  ;;  %v206_v39 = vsel %vm193_vm1, %v189_v30, 0.0  ;;  %v190_v42 = vadd.f32 %v416_v34, %v158_v31  ;;  %v186_v45 = vadd.f32 %v408_v37, %v142_v35 }
  0xec   :  { %195 = vadd.xlane.f32.xlu0 %v194_v36  ;;  %v203_v41 = vsel %vm193_vm1, %v188_v33, 0.0  ;;  %v215_v51 = vsel %vm193_vm1, %v192_v48, 0.0 }
  0xed   :  { %v209_v47 = vsel %vm193_vm1, %v190_v42, 0.0  ;;  %v197_v49 = vsel %vm193_vm1, %v186_v45, 0.0 }
  0xef   :  { %204 = vadd.xlane.f32.xlu1 %v203_v41 }
  0xf0   :  { %207 = vadd.xlane.f32.xlu0 %v206_v39 }
  0xf3   :  { %210 = vadd.xlane.f32.xlu1 %v209_v47 }
  0xf4   :  { %198 = vadd.xlane.f32.xlu0 %v197_v49  ;;  %v387_v49 = vld [vmem:[%s656_s4] ss:$0 sm:$0xff] }
  0xf7   :  { %216 = vadd.xlane.f32.xlu1 %v215_v51 }
  0xf8   :  { %213 = vadd.xlane.f32.xlu0 %v212_v52 }
 0x178   :  { %v202_v53 = vpop.xlane.xlu1 %201 }
 0x179   :  { %v221_v54 = vmul.f32 0.03125, %v202_v53  ;;  %v196_v55 = vpop.xlane.xlu0 %195  ;;  %v388_v53 = vld [vmem:[%s657_s5] ss:$0 sm:$0xff] }
 0x17a   :  { %v219_v56 = vmul.f32 0.03125, %v196_v55 }
 0x17b   :  { %v566_v57 = vsub.f32 %v187_v28, %v221_v54 }
 0x17c   :  { %v568_v58 = vsub.f32 %v185_v29, %v219_v56  ;;  %v205_v59 = vpop.xlane.xlu1 %204 }
 0x17d   :  { %v222_v60 = vmul.f32 0.03125, %v205_v59  ;;  %v208_v61 = vpop.xlane.xlu0 %207  ;;  %v237_v62 = vmul.f32 %v566_v57, %v566_v57 }
 0x17e   :  { %v223_v63 = vmul.f32 0.03125, %v208_v61  ;;  %v235_v2 = vmul.f32 %v568_v58, %v568_v58 }
 0x17f   :  { %v572_v0 = vsub.f32 %v188_v33, %v222_v60  ;;  %v249_v1 = vsel %vm193_vm1, %v237_v62, 0.0 }
 0x180   :  { %v577_v3 = vsub.f32 %v189_v30, %v223_v63  ;;  %v211_v4 = vpop.xlane.xlu1 %210  ;;  %250 = vadd.xlane.f32.xlu0 %v249_v1  ;;  %v243_v10 = vsel %vm193_vm1, %v235_v2, 0.0 }
 0x181   :  { %v224_v5 = vmul.f32 0.03125, %v211_v4  ;;  %v199_v6 = vpop.xlane.xlu0 %198  ;;  %v238_v7 = vmul.f32 %v572_v0, %v572_v0 }
 0x182   :  { %v220_v8 = vmul.f32 0.03125, %v199_v6  ;;  %v239_v11 = vmul.f32 %v577_v3, %v577_v3 }
 0x183   :  { %v252_v9 = vsel %vm193_vm1, %v238_v7, 0.0  ;;  %v585_v12 = vsub.f32 %v190_v42, %v224_v5 }
 0x184   :  { %v587_v13 = vsub.f32 %v186_v45, %v220_v8  ;;  %253 = vadd.xlane.f32.xlu1 %v252_v9  ;;  %v217_v14 = vpop.xlane.xlu1 %216  ;;  %244 = vadd.xlane.f32.xlu0 %v243_v10  ;;  %v255_v19 = vsel %vm193_vm1, %v239_v11, 0.0 }
 0x185   :  { %v226_v15 = vmul.f32 0.03125, %v217_v14  ;;  %v214_v16 = vpop.xlane.xlu0 %213  ;;  %v240_v23 = vmul.f32 %v585_v12, %v585_v12 }
 0x186   :  { %v225_v17 = vmul.f32 0.03125, %v214_v16  ;;  %v236_v18 = vmul.f32 %v587_v13, %v587_v13 }
 0x187   :  { %v592_v20 = vsub.f32 %v192_v48, %v226_v15  ;;  %v258_v25 = vsel %vm193_vm1, %v240_v23, 0.0 }
 0x188   :  { %v594_v21 = vsub.f32 %v191_v50, %v225_v17  ;;  %256 = vadd.xlane.f32.xlu0 %v255_v19  ;;  %v246_v22 = vsel %vm193_vm1, %v236_v18, 0.0 }
 0x189   :  { %247 = vadd.xlane.f32.xlu1 %v246_v22  ;;  %v242_v27 = vmul.f32 %v592_v20, %v592_v20 }
 0x18a   :  { %v241_v24 = vmul.f32 %v594_v21, %v594_v21 }
 0x18b   :  { %v264_v28 = vsel %vm193_vm1, %v242_v27, 0.0 }
 0x18c   :  { %v261_v26 = vsel %vm193_vm1, %v241_v24, 0.0 }
 0x18d   :  { %259 = vadd.xlane.f32.xlu1 %v258_v25  ;;  %262 = vadd.xlane.f32.xlu0 %v261_v26 }
 0x191   :  { %265 = vadd.xlane.f32.xlu1 %v264_v28 }
 0x20d   :  { %v251_v29 = vpop.xlane.xlu0 %250 }
 0x20e   :  { %v269_v30 = vmul.f32 0.03125, %v251_v29 }
 0x210   :  { %v277_v31 = vadd.f32 1e-12, %v269_v30 }
 0x211   :  { %v254_v32 = vpop.xlane.xlu1 %253  ;;  %v245_v33 = vpop.xlane.xlu0 %244 }
 0x212   :  { %464 = vrsqrt.f32 %v277_v31  ;;  %v270_v34 = vmul.f32 0.03125, %v254_v32  ;;  %v267_v35 = vmul.f32 0.03125, %v245_v33 }
 0x214   :  { %v278_v36 = vadd.f32 1e-12, %v270_v34  ;;  %v275_v37 = vadd.f32 1e-12, %v267_v35 }
 0x215   :  { %v257_v38 = vpop.xlane.xlu0 %256 }
 0x216   :  { %466 = vrsqrt.f32 %v278_v36  ;;  %v271_v39 = vmul.f32 0.03125, %v257_v38  ;;  %v248_v40 = vpop.xlane.xlu1 %247 }
 0x217   :  { %468 = vrsqrt.f32 %v275_v37  ;;  %v268_v41 = vmul.f32 0.03125, %v248_v40 }
 0x218   :  { %v279_v42 = vadd.f32 1e-12, %v271_v39 }
 0x219   :  { %v276_v43 = vadd.f32 1e-12, %v268_v41 }
 0x21a   :  { %470 = vrsqrt.f32 %v279_v42  ;;  %v260_v44 = vpop.xlane.xlu1 %259  ;;  %v263_v45 = vpop.xlane.xlu0 %262 }
 0x21b   :  { %472 = vrsqrt.f32 %v276_v43  ;;  %v272_v46 = vmul.f32 0.03125, %v260_v44  ;;  %v273_v47 = vmul.f32 0.03125, %v263_v45 }
 0x21c   :  { %v465_v48 = vpop.eup %464 }
 0x21d   :  { %v293_v50 = vmul.f32 %v465_v48, %v566_v57  ;;  %v280_v51 = vadd.f32 1e-12, %v272_v46  ;;  %v281_v52 = vadd.f32 1e-12, %v273_v47 }
 0x21e   :  { %v266_v54 = vpop.xlane.xlu1 %265 }
 0x21f   :  { %v308_v55 = vmul.f32 %v387_v49, %v293_v50  ;;  %474 = vrsqrt.f32 %v280_v51  ;;  %v274_v56 = vmul.f32 0.03125, %v266_v54 }
 0x220   :  { %v467_v59 = vpop.eup %466  ;;  %476 = vrsqrt.f32 %v281_v52 }
 0x221   :  { %v469_v60 = vpop.eup %468  ;;  %v323_v61 = vadd.f32 %v388_v53, %v308_v55  ;;  %v294_v62 = vmul.f32 %v467_v59, %v572_v0  ;;  %v282_v63 = vadd.f32 1e-12, %v274_v56 }
 0x222   :  { %v291_v57 = vmul.f32 %v469_v60, %v568_v58 }
 0x223   :  { %v399_v1 = vpack.c.bf16 %v323_v61, %v323_v61  ;;  %v309_v2 = vmul.f32 %v387_v49, %v294_v62  ;;  %478 = vrsqrt.f32 %v282_v63 }
 0x224   :  { %v471_v4 = vpop.eup %470  ;;  %v306_v5 = vmul.f32 %v387_v49, %v291_v57 }
 0x225   :  { %v473_v6 = vpop.eup %472  ;;  %364 = vst.msk [vmem:[%s658_s6 + $0x8] sm:$0xf] %vm361_vm2, %v399_v1  ;;  %v324_v7 = vadd.f32 %v388_v53, %v309_v2  ;;  %v295_v8 = vmul.f32 %v471_v4, %v577_v3 }
 0x226   :  { %v321_v9 = vadd.f32 %v388_v53, %v306_v5  ;;  %v292_v0 = vmul.f32 %v473_v6, %v587_v13 }
 0x227   :  { %v400_v10 = vpack.c.bf16 %v324_v7, %v324_v7  ;;  %v310_v11 = vmul.f32 %v387_v49, %v295_v8 }
 0x228   :  { %v397_v58 = vpack.c.bf16 %v321_v9, %v321_v9  ;;  %v307_v14 = vmul.f32 %v387_v49, %v292_v0 }
 0x229   :  { %v475_v15 = vpop.eup %474  ;;  %365 = vst.msk [vmem:[%s658_s6 + $0xc] sm:$0xf] %vm361_vm2, %v400_v10  ;;  %v325_v16 = vadd.f32 %v388_v53, %v310_v11 }
 0x22a   :  { %v477_v17 = vpop.eup %476  ;;  %362 = vst.msk [vmem:[%s658_s6] sm:$0xf] %vm361_vm2, %v397_v58  ;;  %v322_v3 = vadd.f32 %v388_v53, %v307_v14  ;;  %v296_v13 = vmul.f32 %v475_v15, %v585_v12 }
 0x22b   :  { %v401_v18 = vpack.c.bf16 %v325_v16, %v325_v16  ;;  %v297_v19 = vmul.f32 %v477_v17, %v594_v21 }
 0x22c   :  { %v398_v22 = vpack.c.bf16 %v322_v3, %v322_v3  ;;  %v311_v23 = vmul.f32 %v387_v49, %v296_v13 }
 0x22d   :  { %v479_v24 = vpop.eup %478  ;;  %366 = vst.msk [vmem:[%s658_s6 + $0x10] sm:$0xf] %vm361_vm2, %v401_v18  ;;  %v312_v25 = vmul.f32 %v387_v49, %v297_v19 }
 0x22e   :  { %363 = vst.msk [vmem:[%s658_s6 + $0x4] sm:$0xf] %vm361_vm2, %v398_v22  ;;  %v326_v26 = vadd.f32 %v388_v53, %v311_v23  ;;  %v298_v12 = vmul.f32 %v479_v24, %v592_v20 }
 0x22f   :  { %v327_v27 = vadd.f32 %v388_v53, %v312_v25 }
 0x230   :  { %v402_v28 = vpack.c.bf16 %v326_v26, %v326_v26  ;;  %v313_v21 = vmul.f32 %v387_v49, %v298_v12 }
 0x231   :  { %v403_v29 = vpack.c.bf16 %v327_v27, %v327_v27 }
 0x232   :  { %367 = vst.msk [vmem:[%s658_s6 + $0x14] sm:$0xf] %vm361_vm2, %v402_v28  ;;  %v328_v30 = vadd.f32 %v388_v53, %v313_v21 }
 0x233   :  { %368 = vst.msk [vmem:[%s658_s6 + $0x18] sm:$0xf] %vm361_vm2, %v403_v29 }
 0x234   :  { %v404_v31 = vpack.c.bf16 %v328_v30, %v328_v30 }
 0x236   :  { %369 = vst.msk [vmem:[%s658_s6 + $0x1c] sm:$0xf] %vm361_vm2, %v404_v31 }

// kernel: _lambda_.22
= control target key start
LH: loop header
LB: loop body
LE: loop exit
PB: predicated region body
PF: predicated region fallthrough
CT: control target
= control target key end

     0   :  { %v112_v0 = vmov 0.0   ;;  %vm113_vm0 = vmmov 0   ;;  %vm39_vm1 = vcmask 261120   ;;  %vm85_vm2 = vcmask 257024   ;;  %s149_s1 = inlined_call_operand.vmem [shape: bf16[32,32], index: 1, kind: input, shape index: {}]   ;;  %s150_s0 = inlined_call_operand.vmem [shape: bf16[8,32], index: 0, kind: input, shape index: {}]   ;;  %s151_s2 = inlined_call_operand.vmem [shape: f32[1,32], index: 2, kind: input, shape index: {}]   ;;  %s152_s3 = inlined_call_operand.vmem [shape: bf16[8,32], index: 3, kind: output, shape index: {}]  }
   0x1   :  { %98 = vmatprep.subr.bf16.mxu0 %v112_v0  ;;  %v108_v1 = vld [vmem:[%s149_s1] sm:$0xff]   ;;  %102 = vmatprep.mubr.msk.bf16.mxu0 %vm113_vm0, %v112_v0  ;;  %v109_v2 = vld [vmem:[%s149_s1 + $0x8] sm:$0xff]  }
   0x2   :  { %99 = vmatpush3.bf16.msra.mxu0 %v108_v1  ;;  %v15_v3 = vld [vmem:[%s150_s0] sm:$0xf] }
   0x3   :  { %100 = vmatprep.subr.bf16.mxu0 %v112_v0  ;;  %v91_v4 = vld [vmem:[%s151_s2] ss:$0 sm:$0xff] }
   0x6   :  { %101 = vmatpush3.bf16.msra.mxu0 %v109_v2 }
   0x9   :  { %103 = vmatmul.mubr.msk.bf16.vlgmr.msra.gmra.mrb[0].mxu0 %vm39_vm1, %v15_v3 }
  0xdc   :  { %v77_v5 = vpop.f32.mrb[0].mxu0 }
  0xdd   :  { %v78_v6 = vadd.f32 %v91_v4, %v77_v5  ;;  %v104_v7 = vpop.f32.mrb[1].mxu0 }
  0xde   :  { %v80_v8 = vpop.f32.mrb[2].mxu0 }
  0xdf   :  { %110 = vtanh.f32 %v78_v6  ;;  %v105_v9 = vpop.f32.mrb[3].mxu0 }
  0xe9   :  { %v111_v10 = vpop.eup %110 }
  0xea   :  { %v84_v11 = vpack.c.bf16 %v111_v10, %v111_v10 }
  0xec   :  { %86 = vst.msk [vmem:[%s152_s3] sm:$0xf] %vm85_vm2, %v84_v11 }

</bundles_post_ra>
